<compile_context>
chip_gen: v7x
topology: tpu7x:2x2x1
jax: 0.10.0
libtpu: 0.0.40
codegen_flags: <defaults>
</compile_context>

<pallas_src>
import functools
import numpy as np
import jax
import jax.numpy as jnp
from jax.experimental import pallas as pl
from jax.experimental.pallas import tpu as pltpu

LRELU_SLOPE = 0.01   # torch.nn.functional.leaky_relu default negative_slope
BN_EPS = 1e-5        # torch.nn.BatchNorm2d default eps


def _round_up(x, m):
    return (x + m - 1) // m * m


def _cdiv(a, b):
    return -(-a // b)


@functools.lru_cache(maxsize=1)
def _is_v5e():
    try:
        kind = jax.devices()[0].device_kind.lower()
        return ("v5e" in kind) or ("v5 lite" in kind) or ("v5litepod" in kind)
    except Exception:
        return False


# ------------------------------------------------------------------ Pallas kernel
def _conv_stat_kernel(x0_ref, x1_ref, w_ref, m_ref, o_ref, psum_ref, psq_ref,
                      *, offsets, tm):
    """One (i, j) tile: implicit-GEMM 3x3 conv + masked per-channel BN partial stats.

    x0_ref : (tm, Cp)      bf16  flat padded-NHWC rows [i*tm, (i+1)*tm)
    x1_ref : (tm, Cp)      bf16  flat rows [(i+1)*tm, (i+2)*tm)   (shift halo)
    w_ref  : (k*k, Cp, tn) bf16  one (Cp, tn) weight slab per (dy,dx) tap
    m_ref  : (tm, 1)       f32   1.0 on valid output rows, 0.0 on padding/garbage rows
    o_ref  : (tm, tn)      bf16  conv output tile
    psum/psq : (8, tn)     f32   masked per-tile channel sum / sum-of-squares
    """
    # Concatenate current block + halo block; shift in f32 (clean sublane slices),
    # re-cast each shifted operand to bf16 so the MXU dots stay bf16 x bf16.
    x2 = jnp.concatenate([x0_ref[...], x1_ref[...]], axis=0).astype(jnp.float32)

    acc = None
    for p, d in enumerate(offsets):
        if d == 0:
            a = x0_ref[...]
        else:
            a = x2[d:d + tm, :].astype(jnp.bfloat16)
        part = jnp.dot(a, w_ref[p], preferred_element_type=jnp.float32)
        acc = part if acc is None else acc + part

    o_ref[...] = acc.astype(o_ref.dtype)

    # Fused BN batch statistics (garbage rows masked out via the precomputed 0/1 mask).
    ym = acc * m_ref[...]                                   # (tm, tn) * (tm, 1)
    s = jnp.sum(ym, axis=0, keepdims=True)                  # (1, tn)
    q = jnp.sum(ym * ym, axis=0, keepdims=True)             # (1, tn)  (mask is 0/1)
    psum_ref[...] = jnp.broadcast_to(s, psum_ref.shape)     # (8, tn) sublane-broadcast
    psq_ref[...] = jnp.broadcast_to(q, psq_ref.shape)


def _conv_stat_call(n_i, n_j, tm, tn, cp, kk, np_, offsets):
    kern = functools.partial(_conv_stat_kernel, offsets=offsets, tm=tm)
    out_shape = (jax.ShapeDtypeStruct((n_i * tm, np_), jnp.bfloat16),   # conv out (bf16)
                 jax.ShapeDtypeStruct((8 * n_i, np_), jnp.float32),     # per-tile sums
                 jax.ShapeDtypeStruct((8 * n_i, np_), jnp.float32))     # per-tile sumsq
    grid_spec = pltpu.PrefetchScalarGridSpec(
        num_scalar_prefetch=0,
        grid=(n_i, n_j),
        in_specs=[pl.BlockSpec((tm, cp), lambda i, j: (i, 0)),          # current rows
                  pl.BlockSpec((tm, cp), lambda i, j: (i + 1, 0)),      # halo rows
                  pl.BlockSpec((kk, cp, tn), lambda i, j: (0, 0, j)),   # weights
                  pl.BlockSpec((tm, 1), lambda i, j: (i, 0))],          # validity mask
        out_specs=(pl.BlockSpec((tm, tn), lambda i, j: (i, j)),
                   pl.BlockSpec((8, tn), lambda i, j: (i, j)),
                   pl.BlockSpec((8, tn), lambda i, j: (i, j))),
    )
    return pl.pallas_call(
        kern, out_shape=out_shape, grid_spec=grid_spec,
        compiler_params=pltpu.CompilerParams(
            dimension_semantics=("parallel", "parallel")))


# ------------------------------------------------------------------ tiling
def _pick_tiles(mflat, np_, dmax):
    # tn: fill the 256-wide MXU on v6e/v7x; 128 on v5e (4x 128x128 MXU).
    tn = 128 if (_is_v5e() or np_ % 256 != 0) else 256
    # tm: large tile, multiple of 16 (bf16 packing), >= max shift (so block i and i+1
    # cover every shifted read), and >= 2 grid rows along i when possible (v7x 2 TCs).
    tm = 512
    if mflat < 2 * tm:
        tm = max(16, _round_up(_cdiv(mflat, 2), 16))
    tm = max(tm, _round_up(dmax, 16))
    n_i = _cdiv(mflat, tm)
    n_j = np_ // tn
    return tm, tn, n_i, n_j


# ------------------------------------------------------------------ forward (one jit)
def _forward_impl(w3, x, *, cin, cout, k, padding):
    B, _, H, W = x.shape
    Hp, Wp = H + 2 * padding, W + 2 * padding
    Ho, Wo = Hp - k + 1, Wp - k + 1
    Lp = Hp * Wp
    Mflat = B * Lp
    kk, Cp, Np = w3.shape
    # Row shift of tap (dy, dx) in the flattened padded layout.
    offsets = tuple(dy * Wp + dx for dy in range(k) for dx in range(k))
    tm, tn, n_i, n_j = _pick_tiles(Mflat, Np, offsets[-1])
    Mp = n_i * tm

    # NCHW -> flat padded-NHWC rows, bf16 MXU operand.  Only ~1x of the input is
    # materialized (vs 9x for an explicit im2col matrix).
    xh = jnp.transpose(x, (0, 2, 3, 1)).astype(jnp.bfloat16)
    xh = jnp.pad(xh, ((0, 0), (padding, padding), (padding, padding), (0, Cp - cin)))
    xflat = xh.reshape(Mflat, Cp)
    xflat = jnp.pad(xflat, ((0, Mp + tm - Mflat), (0, 0)))  # +tm rows: halo for last tile

    # Row-validity mask for BN stats (excludes spatial pad rows/cols and tail padding).
    p = jnp.arange(Mp, dtype=jnp.int32)
    r = p % Lp
    valid = (p < Mflat) & ((r // Wp) < Ho) & ((r % Wp) < Wo)
    mask = valid.astype(jnp.float32)[:, None]

    conv_out, psum, psq = _conv_stat_call(n_i, n_j, tm, tn, Cp, kk, Np, offsets)(
        xflat, xflat, w3, mask)

    # Tiny partial-stat reduction -> BN scale/shift (f32, in XLA).
    s_tot = jnp.sum(psum.reshape(n_i, 8, Np)[:, 0, :], axis=0)
    q_tot = jnp.sum(psq.reshape(n_i, 8, Np)[:, 0, :], axis=0)
    cnt = float(B * Ho * Wo)
    mean = s_tot / cnt
    var = jnp.maximum(q_tot / cnt - mean * mean, 0.0)       # biased var (torch train mode)
    inv = jax.lax.rsqrt(var + BN_EPS)
    scale = inv[:cout]
    shift = (-mean * inv)[:cout]

    # BN apply + leaky_relu fused into the one unavoidable layout pass
    # (valid-row gather + NCHW transpose): one bf16 read, one f32 NCHW write.
    y = conv_out[:Mflat, :cout].reshape(B, Hp, Wp, cout)[:, :Ho, :Wo, :].astype(jnp.float32)
    y = y * scale + shift
    y = jnp.where(y > 0, y, LRELU_SLOPE * y)
    return jnp.transpose(y, (0, 3, 1, 2))                   # NCHW


@functools.lru_cache(maxsize=None)
def _jitted_forward(cin, cout, k, padding):
    return jax.jit(functools.partial(_forward_impl, cin=cin, cout=cout, k=k,
                                     padding=padding))


def conv_bn_block_forward(params, x, *, stride=1, padding=1):
    assert stride == 1, "Conv_bn_block Pallas kernel only supports stride=1"
    fwd = _jitted_forward(params["cin"], params["cout"], params["k"], padding)
    return fwd(params["w3"], x)


# ------------------------------------------------------------------ params + reference
def make_conv_bn_params(key, in_channels, out_channels, kernel_size=3):
    k = kernel_size
    wkey, bkey = jax.random.split(key)
    fan_in = in_channels * k * k
    bound = float(np.sqrt(1.0 / fan_in))            # torch Conv2d default init bound
    w = jax.random.uniform(wkey, (k, k, in_channels, out_channels), jnp.float32, -bound, bound)
    b = jax.random.uniform(bkey, (out_channels,), jnp.float32, -bound, bound)
    Cp = _round_up(in_channels, 16)                 # bf16 sublane-packed contraction dim
    Np = _round_up(out_channels, 128)
    w3 = jnp.zeros((k * k, Cp, Np), jnp.float32)
    w3 = w3.at[:, :in_channels, :out_channels].set(w.reshape(k * k, in_channels, out_channels))
    w3 = w3.astype(jnp.bfloat16)
    # NOTE: the conv bias is intentionally NOT used by the fused kernel -- with
    # train-mode BatchNorm (gamma=1, beta=0) it cancels exactly in the forward output.
    return {"w": w, "b": b, "w3": w3,
            "cin": in_channels, "cout": out_channels, "k": k}


def _reference_forward(params, x, *, stride=1, padding=1):
    """Pure-JAX f32 reference: Conv2d(+bias) + BatchNorm2d(train, batch stats) + leaky_relu."""
    w = jnp.transpose(params["w"], (3, 2, 0, 1))            # (k,k,cin,cout) -> OIHW
    y = jax.lax.conv_general_dilated(
        x, w, window_strides=(stride, stride),
        padding=((padding, padding), (padding, padding)),
        dimension_numbers=("NCHW", "OIHW", "NCHW"))
    y = y + params["b"][None, :, None, None]
    mean = jnp.mean(y, axis=(0, 2, 3), keepdims=True)
    var = jnp.mean((y - mean) ** 2, axis=(0, 2, 3), keepdims=True)
    yn = (y - mean) * jax.lax.rsqrt(var + BN_EPS)
    return jnp.where(yn > 0, yn, LRELU_SLOPE * yn)


# ------------------------------------------------------------------ main
if __name__ == "__main__":
    key = jax.random.PRNGKey(0)
    B, CIN, H, W, COUT = 2, 4, 16, 16, 32

    params = make_conv_bn_params(key, CIN, COUT, 3)
    x = jax.random.normal(jax.random.fold_in(key, 1), (B, CIN, H, W), jnp.float32)

    y = conv_bn_block_forward(params, x)
    jax.block_until_ready(y)

    assert y.shape == (B, COUT, H, W), y.shape
    assert bool(jnp.all(jnp.isfinite(y)))

    y_ref = _reference_forward(params, x)
    max_err = float(jnp.max(jnp.abs(y - y_ref)))
    assert max_err < 0.1, f"max abs error vs reference = {max_err}"

    print("KERNEL_OK")
</pallas_src>

<mosaic_0001>
module attributes {stable_mosaic.version = 11 : i64} {
  func.func @_conv_stat_kernel(%arg0: i32, %arg1: i32, %arg2: memref<336x16xbf16, #tpu.memory_space<vmem>>, %arg3: memref<336x16xbf16, #tpu.memory_space<vmem>>, %arg4: memref<9x16x128xbf16, #tpu.memory_space<vmem>>, %arg5: memref<336x1xf32, #tpu.memory_space<vmem>>, %arg6: memref<336x128xbf16, #tpu.memory_space<vmem>>, %arg7: memref<8x128xf32, #tpu.memory_space<vmem>>, %arg8: memref<8x128xf32, #tpu.memory_space<vmem>>) attributes {dimension_semantics = [#tpu.dimension_semantics<parallel>, #tpu.dimension_semantics<parallel>], iteration_bounds = array<i64: 2, 1>, scalar_prefetch = 0 : i64, scratch_operands = 0 : i64, tpu.core_type = #tpu.core_type<tc>, window_params = [{transform_indices = @transform_0, window_bounds = array<i64: 336, 16>}, {transform_indices = @transform_1, window_bounds = array<i64: 336, 16>}, {transform_indices = @transform_2, window_bounds = array<i64: 9, 16, 128>}, {transform_indices = @transform_3, window_bounds = array<i64: 336, 1>}, {transform_indices = @transform_4, window_bounds = array<i64: 336, 128>}, {transform_indices = @transform_5, window_bounds = array<i64: 8, 128>}, {transform_indices = @transform_6, window_bounds = array<i64: 8, 128>}]} {
    %c0 = arith.constant 0 : index
    %c0_0 = arith.constant 0 : index
    %0 = vector.load %arg2[%c0, %c0_0] : memref<336x16xbf16, #tpu.memory_space<vmem>>, vector<336x16xbf16>
    %c0_1 = arith.constant 0 : index
    %c0_2 = arith.constant 0 : index
    %1 = vector.load %arg3[%c0_1, %c0_2] : memref<336x16xbf16, #tpu.memory_space<vmem>>, vector<336x16xbf16>
    %2 = tpu.concatenate %0, %1 in 0 : vector<336x16xbf16>, vector<336x16xbf16> -> vector<672x16xbf16>
    %3 = arith.extf %2 : vector<672x16xbf16> to vector<672x16xf32>
    %c0_3 = arith.constant 0 : index
    %c0_4 = arith.constant 0 : index
    %4 = vector.load %arg2[%c0_3, %c0_4] : memref<336x16xbf16, #tpu.memory_space<vmem>>, vector<336x16xbf16>
    %c0_5 = arith.constant 0 : index
    %c0_6 = arith.constant 0 : index
    %c0_7 = arith.constant 0 : index
    %5 = vector.load %arg4[%c0_5, %c0_6, %c0_7] : memref<9x16x128xbf16, #tpu.memory_space<vmem>>, vector<1x16x128xbf16>
    %6 = vector.shape_cast %5 : vector<1x16x128xbf16> to vector<16x128xbf16>
    %cst = arith.constant dense<0.000000e+00> : vector<336x128xf32>
    %7 = tpu.matmul %4, %6, %cst {dimension_numbers = #tpu.dot_dimension_numbers<[1], [0], [0], [1], [0, 0, 1, 1], [], []>} : vector<336x16xbf16>, vector<16x128xbf16>, vector<336x128xf32> -> vector<336x128xf32>
    %8 = vector.extract_strided_slice %3 {offsets = [1, 0], sizes = [336, 16], strides = [1, 1]} : vector<672x16xf32> to vector<336x16xf32>
    %9 = arith.truncf %8 : vector<336x16xf32> to vector<336x16xbf16>
    %c1 = arith.constant 1 : index
    %c0_8 = arith.constant 0 : index
    %c0_9 = arith.constant 0 : index
    %10 = vector.load %arg4[%c1, %c0_8, %c0_9] : memref<9x16x128xbf16, #tpu.memory_space<vmem>>, vector<1x16x128xbf16>
    %11 = vector.shape_cast %10 : vector<1x16x128xbf16> to vector<16x128xbf16>
    %cst_10 = arith.constant dense<0.000000e+00> : vector<336x128xf32>
    %12 = tpu.matmul %9, %11, %cst_10 {dimension_numbers = #tpu.dot_dimension_numbers<[1], [0], [0], [1], [0, 0, 1, 1], [], []>} : vector<336x16xbf16>, vector<16x128xbf16>, vector<336x128xf32> -> vector<336x128xf32>
    %13 = arith.addf %7, %12 : vector<336x128xf32>
    %14 = vector.extract_strided_slice %3 {offsets = [2, 0], sizes = [336, 16], strides = [1, 1]} : vector<672x16xf32> to vector<336x16xf32>
    %15 = arith.truncf %14 : vector<336x16xf32> to vector<336x16xbf16>
    %c2 = arith.constant 2 : index
    %c0_11 = arith.constant 0 : index
    %c0_12 = arith.constant 0 : index
    %16 = vector.load %arg4[%c2, %c0_11, %c0_12] : memref<9x16x128xbf16, #tpu.memory_space<vmem>>, vector<1x16x128xbf16>
    %17 = vector.shape_cast %16 : vector<1x16x128xbf16> to vector<16x128xbf16>
    %cst_13 = arith.constant dense<0.000000e+00> : vector<336x128xf32>
    %18 = tpu.matmul %15, %17, %cst_13 {dimension_numbers = #tpu.dot_dimension_numbers<[1], [0], [0], [1], [0, 0, 1, 1], [], []>} : vector<336x16xbf16>, vector<16x128xbf16>, vector<336x128xf32> -> vector<336x128xf32>
    %19 = arith.addf %13, %18 : vector<336x128xf32>
    %20 = vector.extract_strided_slice %3 {offsets = [18, 0], sizes = [336, 16], strides = [1, 1]} : vector<672x16xf32> to vector<336x16xf32>
    %21 = arith.truncf %20 : vector<336x16xf32> to vector<336x16xbf16>
    %c3 = arith.constant 3 : index
    %c0_14 = arith.constant 0 : index
    %c0_15 = arith.constant 0 : index
    %22 = vector.load %arg4[%c3, %c0_14, %c0_15] : memref<9x16x128xbf16, #tpu.memory_space<vmem>>, vector<1x16x128xbf16>
    %23 = vector.shape_cast %22 : vector<1x16x128xbf16> to vector<16x128xbf16>
    %cst_16 = arith.constant dense<0.000000e+00> : vector<336x128xf32>
    %24 = tpu.matmul %21, %23, %cst_16 {dimension_numbers = #tpu.dot_dimension_numbers<[1], [0], [0], [1], [0, 0, 1, 1], [], []>} : vector<336x16xbf16>, vector<16x128xbf16>, vector<336x128xf32> -> vector<336x128xf32>
    %25 = arith.addf %19, %24 : vector<336x128xf32>
    %26 = vector.extract_strided_slice %3 {offsets = [19, 0], sizes = [336, 16], strides = [1, 1]} : vector<672x16xf32> to vector<336x16xf32>
    %27 = arith.truncf %26 : vector<336x16xf32> to vector<336x16xbf16>
    %c4 = arith.constant 4 : index
    %c0_17 = arith.constant 0 : index
    %c0_18 = arith.constant 0 : index
    %28 = vector.load %arg4[%c4, %c0_17, %c0_18] : memref<9x16x128xbf16, #tpu.memory_space<vmem>>, vector<1x16x128xbf16>
    %29 = vector.shape_cast %28 : vector<1x16x128xbf16> to vector<16x128xbf16>
    %cst_19 = arith.constant dense<0.000000e+00> : vector<336x128xf32>
    %30 = tpu.matmul %27, %29, %cst_19 {dimension_numbers = #tpu.dot_dimension_numbers<[1], [0], [0], [1], [0, 0, 1, 1], [], []>} : vector<336x16xbf16>, vector<16x128xbf16>, vector<336x128xf32> -> vector<336x128xf32>
    %31 = arith.addf %25, %30 : vector<336x128xf32>
    %32 = vector.extract_strided_slice %3 {offsets = [20, 0], sizes = [336, 16], strides = [1, 1]} : vector<672x16xf32> to vector<336x16xf32>
    %33 = arith.truncf %32 : vector<336x16xf32> to vector<336x16xbf16>
    %c5 = arith.constant 5 : index
    %c0_20 = arith.constant 0 : index
    %c0_21 = arith.constant 0 : index
    %34 = vector.load %arg4[%c5, %c0_20, %c0_21] : memref<9x16x128xbf16, #tpu.memory_space<vmem>>, vector<1x16x128xbf16>
    %35 = vector.shape_cast %34 : vector<1x16x128xbf16> to vector<16x128xbf16>
    %cst_22 = arith.constant dense<0.000000e+00> : vector<336x128xf32>
    %36 = tpu.matmul %33, %35, %cst_22 {dimension_numbers = #tpu.dot_dimension_numbers<[1], [0], [0], [1], [0, 0, 1, 1], [], []>} : vector<336x16xbf16>, vector<16x128xbf16>, vector<336x128xf32> -> vector<336x128xf32>
    %37 = arith.addf %31, %36 : vector<336x128xf32>
    %38 = vector.extract_strided_slice %3 {offsets = [36, 0], sizes = [336, 16], strides = [1, 1]} : vector<672x16xf32> to vector<336x16xf32>
    %39 = arith.truncf %38 : vector<336x16xf32> to vector<336x16xbf16>
    %c6 = arith.constant 6 : index
    %c0_23 = arith.constant 0 : index
    %c0_24 = arith.constant 0 : index
    %40 = vector.load %arg4[%c6, %c0_23, %c0_24] : memref<9x16x128xbf16, #tpu.memory_space<vmem>>, vector<1x16x128xbf16>
    %41 = vector.shape_cast %40 : vector<1x16x128xbf16> to vector<16x128xbf16>
    %cst_25 = arith.constant dense<0.000000e+00> : vector<336x128xf32>
    %42 = tpu.matmul %39, %41, %cst_25 {dimension_numbers = #tpu.dot_dimension_numbers<[1], [0], [0], [1], [0, 0, 1, 1], [], []>} : vector<336x16xbf16>, vector<16x128xbf16>, vector<336x128xf32> -> vector<336x128xf32>
    %43 = arith.addf %37, %42 : vector<336x128xf32>
    %44 = vector.extract_strided_slice %3 {offsets = [37, 0], sizes = [336, 16], strides = [1, 1]} : vector<672x16xf32> to vector<336x16xf32>
    %45 = arith.truncf %44 : vector<336x16xf32> to vector<336x16xbf16>
    %c7 = arith.constant 7 : index
    %c0_26 = arith.constant 0 : index
    %c0_27 = arith.constant 0 : index
    %46 = vector.load %arg4[%c7, %c0_26, %c0_27] : memref<9x16x128xbf16, #tpu.memory_space<vmem>>, vector<1x16x128xbf16>
    %47 = vector.shape_cast %46 : vector<1x16x128xbf16> to vector<16x128xbf16>
    %cst_28 = arith.constant dense<0.000000e+00> : vector<336x128xf32>
    %48 = tpu.matmul %45, %47, %cst_28 {dimension_numbers = #tpu.dot_dimension_numbers<[1], [0], [0], [1], [0, 0, 1, 1], [], []>} : vector<336x16xbf16>, vector<16x128xbf16>, vector<336x128xf32> -> vector<336x128xf32>
    %49 = arith.addf %43, %48 : vector<336x128xf32>
    %50 = vector.extract_strided_slice %3 {offsets = [38, 0], sizes = [336, 16], strides = [1, 1]} : vector<672x16xf32> to vector<336x16xf32>
    %51 = arith.truncf %50 : vector<336x16xf32> to vector<336x16xbf16>
    %c8 = arith.constant 8 : index
    %c0_29 = arith.constant 0 : index
    %c0_30 = arith.constant 0 : index
    %52 = vector.load %arg4[%c8, %c0_29, %c0_30] : memref<9x16x128xbf16, #tpu.memory_space<vmem>>, vector<1x16x128xbf16>
    %53 = vector.shape_cast %52 : vector<1x16x128xbf16> to vector<16x128xbf16>
    %cst_31 = arith.constant dense<0.000000e+00> : vector<336x128xf32>
    %54 = tpu.matmul %51, %53, %cst_31 {dimension_numbers = #tpu.dot_dimension_numbers<[1], [0], [0], [1], [0, 0, 1, 1], [], []>} : vector<336x16xbf16>, vector<16x128xbf16>, vector<336x128xf32> -> vector<336x128xf32>
    %55 = arith.addf %49, %54 : vector<336x128xf32>
    %56 = arith.truncf %55 : vector<336x128xf32> to vector<336x128xbf16>
    %c0_32 = arith.constant 0 : index
    %c0_33 = arith.constant 0 : index
    %57 = vector.load %arg6[%c0_32, %c0_33] : memref<336x128xbf16, #tpu.memory_space<vmem>>, vector<336x128xbf16>
    tpu.vector_store %arg6[%c0_32, %c0_33], %56 {strides = array<i32>} : memref<336x128xbf16, #tpu.memory_space<vmem>>, vector<336x128xbf16>,
    %c0_34 = arith.constant 0 : index
    %c0_35 = arith.constant 0 : index
    %58 = vector.load %arg5[%c0_34, %c0_35] : memref<336x1xf32, #tpu.memory_space<vmem>>, vector<336x1xf32>
    %59 = vector.broadcast %58 : vector<336x1xf32> to vector<336x128xf32>
    %60 = arith.mulf %55, %59 : vector<336x128xf32>
    %cst_36 = arith.constant dense<0.000000e+00> : vector<128xf32>
    %61 = vector.multi_reduction <add>, %60, %cst_36 [0] : vector<336x128xf32> to vector<128xf32>
    %62 = vector.shape_cast %61 : vector<128xf32> to vector<1x128xf32>
    %63 = arith.mulf %60, %60 : vector<336x128xf32>
    %cst_37 = arith.constant dense<0.000000e+00> : vector<128xf32>
    %64 = vector.multi_reduction <add>, %63, %cst_37 [0] : vector<336x128xf32> to vector<128xf32>
    %65 = vector.shape_cast %64 : vector<128xf32> to vector<1x128xf32>
    %66 = vector.shape_cast %62 : vector<1x128xf32> to vector<1x128xf32>
    %67 = vector.broadcast %66 : vector<1x128xf32> to vector<8x128xf32>
    %c0_38 = arith.constant 0 : index
    %c0_39 = arith.constant 0 : index
    %68 = vector.load %arg7[%c0_38, %c0_39] : memref<8x128xf32, #tpu.memory_space<vmem>>, vector<8x128xf32>
    tpu.vector_store %arg7[%c0_38, %c0_39], %67 {strides = array<i32>} : memref<8x128xf32, #tpu.memory_space<vmem>>, vector<8x128xf32>,
    %69 = vector.shape_cast %65 : vector<1x128xf32> to vector<1x128xf32>
    %70 = vector.broadcast %69 : vector<1x128xf32> to vector<8x128xf32>
    %c0_40 = arith.constant 0 : index
    %c0_41 = arith.constant 0 : index
    %71 = vector.load %arg8[%c0_40, %c0_41] : memref<8x128xf32, #tpu.memory_space<vmem>>, vector<8x128xf32>
    tpu.vector_store %arg8[%c0_40, %c0_41], %70 {strides = array<i32>} : memref<8x128xf32, #tpu.memory_space<vmem>>, vector<8x128xf32>,
    return
  }
  func.func @transform_0(%arg0: i32, %arg1: i32) -> (i32, i32) {
    %c0_i32 = arith.constant 0 : i32
    %c0_i32_0 = arith.constant 0 : i32
    return %arg0, %c0_i32 : i32, i32
  }
  func.func @transform_1(%arg0: i32, %arg1: i32) -> (i32, i32) {
    %c1_i32 = arith.constant 1 : i32
    %0 = arith.addi %arg0, %c1_i32 : i32
    %c0_i32 = arith.constant 0 : i32
    %c0_i32_0 = arith.constant 0 : i32
    return %0, %c0_i32 : i32, i32
  }
  func.func @transform_2(%arg0: i32, %arg1: i32) -> (i32, i32, i32) {
    %c0_i32 = arith.constant 0 : i32
    %c0_i32_0 = arith.constant 0 : i32
    %c0_i32_1 = arith.constant 0 : i32
    return %c0_i32, %c0_i32_0, %arg1 : i32, i32, i32
  }
  func.func @transform_3(%arg0: i32, %arg1: i32) -> (i32, i32) {
    %c0_i32 = arith.constant 0 : i32
    %c0_i32_0 = arith.constant 0 : i32
    return %arg0, %c0_i32 : i32, i32
  }
  func.func @transform_4(%arg0: i32, %arg1: i32) -> (i32, i32) {
    %c0_i32 = arith.constant 0 : i32
    return %arg0, %arg1 : i32, i32
  }
  func.func @transform_5(%arg0: i32, %arg1: i32) -> (i32, i32) {
    %c0_i32 = arith.constant 0 : i32
    return %arg0, %arg1 : i32, i32
  }
  func.func @transform_6(%arg0: i32, %arg1: i32) -> (i32, i32) {
    %c0_i32 = arith.constant 0 : i32
    return %arg0, %arg1 : i32, i32
  }
}

</mosaic_0001>

<bundles_post_ra>
// kernel: _forward_impl.1
= control target key start
LH: loop header
LB: loop body
LE: loop exit
PB: predicated region body
PF: predicated region fallthrough
CT: control target
= control target key end

     0   :  { %s6873_s21 = smov 0   ;;  %s6875_s22 = smov 0   ;;  %s8402_s0 = inlined_call_operand.vmem [shape: bf16[1008,16], index: 0, kind: input, shape index: {}, may-alias: {0,1}]   ;;  %s8403_s1 = inlined_call_operand.vmem [shape: bf16[1008,16], index: 1, kind: input, shape index: {}, may-alias: {0,1}]   ;;  %s8404_s2 = inlined_call_operand.vmem [shape: bf16[9,16,128], index: 2, kind: input, shape index: {}]   ;;  %s8405_s3 = inlined_call_operand.vmem [shape: f32[672,1], index: 3, kind: input, shape index: {}]   ;;  %s8406_s4 = inlined_call_operand.vmem [shape: bf16[672,128], index: 4, kind: output, shape index: {0}]   ;;  %s8407_s5 = inlined_call_operand.vmem [shape: f32[16,128], index: 5, kind: output, shape index: {1}]   ;;  %s8408_s6 = inlined_call_operand.vmem [shape: f32[16,128], index: 6, kind: output, shape index: {2}]  }
   0x1   :  { %s6877_s23 = smov 0  }
   0x2 LB: > { %s29_s24 = sadd.s32 1, %s6829_s22  ;;  %p4661_p0 = scmp.ge.s32.totalorder %s6833_s23, 1  ;;  %s6833_s23 = sphi %s6877_s23, %s17_s23   ;;  %s6829_s22 = sphi %s6875_s22, %s8499_s22   ;;  %s6825_s21 = sphi %s6873_s21, %s8498_s21  }
   0x3   : > { %p31_p1 = scmp.ge.s32.totalorder %s29_s24, 2  ;;  %p271_p2 = scmp.lt.s32.totalorder %s6833_s23, 3 }
   0x5   : > { %s8501_s24 = smov (%p31_p1, %s29_s24), 0  ;;  %p272_p3 = pnand %p4661_p0, %p271_p2 }
   0x7   : > { %275 = sbr.rel (%p272_p3) target bundleno = 1018 (0x3fa), region = 36 }
   0xe   : > { %v6756_v0 = vld [vmem:[%s8404_s2 + $0x20] sm:$0xff]   ;;  %v6835_v1 = vmov 0.0   ;;  %v6757_v2 = vld [vmem:[%s8404_s2 + $0x8] sm:$0xff]   ;;  %vm6836_vm0 = vmmov 0   ;;  %s6904_s29 = smul.u32 42, %s6825_s21  ;;  %vm826_vm3 = vcmask 130048  }
   0xf   : > { %5665 = vmatprep.subr.bf16.mxu0 %v6835_v1  ;;  %5321 = vmatprep.subr.bf16.mxu1 %v6835_v1  ;;  %vm647_vm1 = vsmask.f32 7424  ;;  %vm2011_vm2 = vsmask.f32 6400  ;;  %v6761_v25 = vld [vmem:[%s8404_s2 + $0x28] sm:$0xff]   ;;  %v6762_v28 = vld [vmem:[%s8404_s2] sm:$0xff]  }
  0x10   : > { %5666 = vmatpush3.bf16.msra.mxu0 %v6756_v0  ;;  %5323 = vmatprep.mubr.msk.bf16.mxu1 %vm6836_vm0, %v6835_v1  ;;  %p334_p4 = scmp.lt.s32.totalorder %s6904_s29, 125  ;;  %s339_s15 = sadd.s32 1, %s6825_s21  ;;  %vm2424_vm4 = vcmask 1045504   ;;  %vm1386_vm5 = vcmask 1046528   ;;  %vm3049_vm6 = vsmask.f32 5376 }
  0x11   : > { %5322 = vmatpush3.bf16.msra.mxu1 %v6757_v2  ;;  %5667 = vmatprep.mubr.msk.bf16.mxu0 %vm6836_vm0, %v6835_v1  ;;  %s340_s16 = smul.u32 42, %s339_s15  ;;  %p352_p6 = scmp.lt.s32.totalorder %s6904_s29, 83  ;;  %vm3462_vm7 = vcmask 1044480  }
  0x12   : > { %5751 = vmatprep.subr.bf16.mxu0 %v6835_v1  ;;  %5407 = vmatprep.subr.bf16.mxu1 %v6835_v1  ;;  %s335_s30 = scalar_select %p334_p4, %s6904_s29, 125 }
  0x13   : > { %p341_p5 = scmp.lt.s32.totalorder %s340_s16, 125  ;;  %s8505_s29 = smov (!%p352_p6, %s6904_s29), 83 }
  0x14   : > { %s4662_s7 = sshll.u32 %s335_s30, 2  ;;  %s4664_s15 = sshll.u32 %s8505_s29, 3 }
  0x15   : > { %s6915_s10 = scalar_lea.vmem %s8402_s0, %s4662_s7  ;;  %s8503_s16 = smov (!%p341_p5, %s340_s16), 125 }
  0x16   : > { %v6918_v3 = vld [vmem:[%s6915_s10] sm:$0xff]   ;;  %v6921_v4 = vld [vmem:[%s6915_s10 + $0x8] sm:$0xff]   ;;  %v6924_v5 = vld [vmem:[%s6915_s10 + $0x10] sm:$0xff]   ;;  %s4663_s17 = sshll.u32 %s8503_s16, 2  ;;  %s7988_s18 = scalar_lea.vmem %s8405_s3, %s4664_s15 }
  0x17   : > { %v649_v6 = vshrl.u32 %v6918_v3, 16  ;;  %v651_v7 = vshll.u32 %v6918_v3, 16  ;;  %v656_v8 = vshll.u32 %v6921_v4, 16  ;;  %v660_v9 = vshrl.u32 %v6921_v4, 16  ;;  %v6937_v12 = vld [vmem:[%s6915_s10 + $0x18] sm:$0xff]   ;;  %v6948_v23 = vld [vmem:[%s6915_s10 + $0x20] sm:$0xff]   ;;  %s7042_s20 = scalar_lea.vmem %s8403_s1, %s4663_s17 }
  0x18   : > { %v6931_v10 = vshll.u32 %v6924_v5, 16  ;;  %v6934_v11 = vshrl.u32 %v6924_v5, 16  ;;  %v6942_v19 = vshll.u32 %v6937_v12, 16  ;;  %v6945_v22 = vshrl.u32 %v6937_v12, 16  ;;  %v6979_v39 = vld [vmem:[%s6915_s10 + $0x28] sm:$0xff]   ;;  %v6998_v47 = vld [vmem:[%s6915_s10 + $0x30] sm:$0xff]  }
  0x19   : > { %v653_v13 = vrot.slane %v651_v7, 1  ;;  %v658_v14 = vrot.slane %v656_v8, 1  ;;  %v2012_v15 = vrot.slane %v660_v9, 1  ;;  %v2013_v16 = vrot.slane %v656_v8, 2  ;;  %v7023_v60 = vld [vmem:[%s6915_s10 + $0x38] sm:$0xff]   ;;  %p366_p7 = scmp.lt.s32.totalorder %s6825_s21, 1 }
  0x1a   : > { %v2015_v17 = vrot.slane %v6934_v11, 1  ;;  %v2016_v18 = vrot.slane %v6931_v10, 2  ;;  %v2020_v26 = vrot.slane %v6942_v19, 2  ;;  %v2019_v29 = vrot.slane %v6945_v22, 1 }
  0x1b   : > { %v654_v20 = vor.u32 %v653_v13, %v649_v6  ;;  %v2014_v21 = vor.u32 %v2013_v16, %v2012_v15  ;;  %v662_v31 = vor.u32 %v660_v9, %v658_v14  ;;  %v666_v32 = vrot.slane %v6931_v10, 1  ;;  %v7049_v13 = vld [vmem:[%s6915_s10 + $0x40] sm:$0xff]   ;;  %s8507_s21 = smov (!%p366_p7, %s6825_s21), 1 }
  0x1c   : > { %v2017_v24 = vor.u32 %v2016_v18, %v2015_v17  ;;  %v6966_v33 = vshll.u32 %v6948_v23, 16  ;;  %v6969_v34 = vshrl.u32 %v6948_v23, 16  ;;  %v2021_v35 = vor.u32 %v2020_v26, %v2019_v29  ;;  %v7070_v26 = vld [vmem:[%s6915_s10 + $0x48] sm:$0xff]  }
  0x1d   : > { %v659_v27 = vsel %vm647_vm1, %v654_v20, %v658_v14  ;;  %v667_v36 = vsel %vm647_vm1, %v662_v31, %v666_v32  ;;  %v670_v41 = vor.u32 %v6934_v11, %v666_v32  ;;  %v674_v42 = vrot.slane %v6942_v19, 1 }
  0x1e   : > { %5324 = vmatmul.mubr.msk.bf16.vlgmr.msra.gmra.mrb[0].mxu1 %vm826_vm3, %v659_v27  ;;  %v2018_v30 = vsel %vm2011_vm2, %v2014_v21, %v2017_v24  ;;  %v2023_v37 = vrot.slane %v6969_v34, 1  ;;  %v2024_v38 = vrot.slane %v6966_v33, 2  ;;  %v2022_v40 = vsel %vm2011_vm2, %v2017_v24, %v2021_v35 }
  0x1f   : > { %5668 = vmatmul.mubr.msk.bf16.vlgmr.msra.gmra.mrb[0].mxu0 %vm826_vm3, %v2018_v30  ;;  %5327 = vmatprep.mubr.msk.bf16.mxu1 %vm6836_vm0, %v6835_v1  ;;  %v6991_v44 = vshll.u32 %v6979_v39, 16  ;;  %v6994_v45 = vshrl.u32 %v6979_v39, 16  ;;  %v675_v46 = vsel %vm647_vm1, %v670_v41, %v674_v42  ;;  %v678_v51 = vor.u32 %v6945_v22, %v674_v42 }
  0x20   : > { %5752 = vmatpush3.bf16.msra.mxu0 %v6761_v25  ;;  %5671 = vmatprep.mubr.msk.bf16.mxu0 %vm6836_vm0, %v6835_v1  ;;  %v2025_v43 = vor.u32 %v2024_v38, %v2023_v37  ;;  %v682_v52 = vrot.slane %v6966_v33, 1  ;;  %v7013_v54 = vshll.u32 %v6998_v47, 16  ;;  %v7016_v55 = vshrl.u32 %v6998_v47, 16  ;;  %v7091_v38 = vld [vmem:[%s6915_s10 + $0x50] sm:$0xff]  }
  0x21   : > { %5408 = vmatpush3.bf16.msra.mxu1 %v6762_v28  ;;  %5837 = vmatprep.subr.bf16.mxu0 %v6835_v1  ;;  %v2027_v49 = vrot.slane %v6994_v45, 1  ;;  %v2028_v50 = vrot.slane %v6991_v44, 2  ;;  %v690_v62 = vrot.slane %v6991_v44, 1  ;;  %v7034_v0 = vshll.u32 %v7023_v60, 16 }
  0x22   : > { %5493 = vmatprep.subr.bf16.mxu1 %v6835_v1  ;;  %v2026_v48 = vsel %vm2011_vm2, %v2021_v35, %v2025_v43  ;;  %v683_v56 = vsel %vm647_vm1, %v678_v51, %v682_v52  ;;  %v2031_v58 = vrot.slane %v7016_v55, 1  ;;  %v2032_v59 = vrot.slane %v7013_v54, 2 }
  0x23   : > { %v2029_v53 = vor.u32 %v2028_v50, %v2027_v49  ;;  %v686_v61 = vor.u32 %v6969_v34, %v682_v52  ;;  %v7037_v2 = vshrl.u32 %v7023_v60, 16  ;;  %v2036_v9 = vrot.slane %v7034_v0, 2  ;;  %v7112_v52 = vld [vmem:[%s6915_s10 + $0x58] sm:$0xff]  }
  0x24   : > { %v2033_v63 = vor.u32 %v2032_v59, %v2031_v58  ;;  %v694_v14 = vor.u32 %v6994_v45, %v690_v62  ;;  %v698_v15 = vrot.slane %v7013_v54, 1  ;;  %v7060_v17 = vshll.u32 %v7049_v13, 16 }
  0x25   : > { %v2030_v57 = vsel %vm2011_vm2, %v2025_v43, %v2029_v53  ;;  %v691_v6 = vsel %vm647_vm1, %v686_v61, %v690_v62  ;;  %v2035_v8 = vrot.slane %v7037_v2, 1  ;;  %v7063_v18 = vshrl.u32 %v7049_v13, 16 }
  0x26   : > { %5328 = vmatmul.mubr.msk.bf16.gmra.mrb[4].mxu1 %vm826_vm3, %v667_v36  ;;  %v2034_v7 = vsel %vm2011_vm2, %v2029_v53, %v2033_v63  ;;  %v699_v20 = vsel %vm647_vm1, %v694_v14, %v698_v15  ;;  %v2040_v25 = vrot.slane %v7060_v17, 2  ;;  %v702_v27 = vor.u32 %v7016_v55, %v698_v15 }
  0x27   : > { %5672 = vmatmul.mubr.msk.bf16.gmra.mrb[4].mxu0 %vm826_vm3, %v2022_v40  ;;  %5331 = vmatprep.mubr.msk.bf16.mxu1 %vm6836_vm0, %v6835_v1  ;;  %v2037_v16 = vor.u32 %v2036_v9, %v2035_v8  ;;  %v2039_v24 = vrot.slane %v7063_v18, 1  ;;  %v706_v28 = vrot.slane %v7034_v0, 1  ;;  %v7081_v30 = vshll.u32 %v7070_v26, 16 }
  0x28   : > { %5675 = vmatprep.mubr.msk.bf16.mxu0 %vm6836_vm0, %v6835_v1  ;;  %v7084_v31 = vshrl.u32 %v7070_v26, 16  ;;  %v714_v41 = vrot.slane %v7060_v17, 1  ;;  %v7102_v43 = vshll.u32 %v7091_v38, 16  ;;  %v7123_v58 = vshll.u32 %v7112_v52, 16 }
  0x29   : > { %v2038_v21 = vsel %vm2011_vm2, %v2033_v63, %v2037_v16  ;;  %v2041_v29 = vor.u32 %v2040_v25, %v2039_v24  ;;  %v707_v32 = vsel %vm647_vm1, %v702_v27, %v706_v28  ;;  %v2044_v37 = vrot.slane %v7081_v30, 2 }
  0x2a   : > { %v2043_v36 = vrot.slane %v7084_v31, 1  ;;  %v710_v40 = vor.u32 %v7037_v2, %v706_v28  ;;  %8450 = vst [vmem:[#allocation2_spill] sm:$0xff] %v7102_v43  ;;  %v2048_v51 = vrot.slane %v7102_v43, 2  ;;  %v718_v53 = vor.u32 %v7063_v18, %v714_v41  ;;  %8451 = vst [vmem:[#allocation3_spill] sm:$0xff] %v7123_v58 }
  0x2b   : > { %v2042_v35 = vsel %vm2011_vm2, %v2037_v16, %v2041_v29  ;;  %v7126_v59 = vshrl.u32 %v7112_v52, 16  ;;  %v730_v9 = vrot.slane %v7102_v43, 1  ;;  %v738_v28 = vrot.slane %v7123_v58, 1  ;;  %v6786_v43 = vld [vmem:[%s8404_s2 + $0x38] sm:$0xff]  }
  0x2c   : > { %v2045_v42 = vor.u32 %v2044_v37, %v2043_v36 }
  0x2d   : > { %8452 = vst [vmem:[#allocation4_spill] sm:$0xff] %v7126_v59  ;;  %v2051_v63 = vrot.slane %v7126_v59, 1  ;;  %v742_v36 = vor.u32 %v7126_v59, %v738_v28 }
  0x2e   : > { %5332 = vmatmul.mubr.msk.bf16.gmra.mrb[8].mxu1 %vm826_vm3, %v675_v46  ;;  %v7105_v46 = vshrl.u32 %v7091_v38, 16  ;;  %v2046_v49 = vsel %vm2011_vm2, %v2041_v29, %v2045_v42 }
  0x2f   : > { %5676 = vmatmul.mubr.msk.bf16.gmra.mrb[8].mxu0 %vm826_vm3, %v2026_v48  ;;  %5335 = vmatprep.mubr.msk.bf16.mxu1 %vm6836_vm0, %v6835_v1  ;;  %v715_v48 = vsel %vm647_vm1, %v710_v40, %v714_v41  ;;  %v7173_v40 = vld [vmem:[%s6915_s10 + $0x68] sm:$0xff]   ;;  %v2425_v41 = vrot.slane %v6921_v4, 2 }
  0x30   : > { %5679 = vmatprep.mubr.msk.bf16.mxu0 %vm6836_vm0, %v6835_v1  ;;  %v2047_v50 = vrot.slane %v7105_v46, 1  ;;  %v734_v27 = vor.u32 %v7105_v46, %v730_v9 }
  0x36   : > { %5336 = vmatmul.mubr.msk.bf16.gmra.mrb[12].mxu1 %vm826_vm3, %v683_v56  ;;  %v722_v56 = vrot.slane %v7081_v30, 1 }
  0x37   : > { %5680 = vmatmul.mubr.msk.bf16.gmra.mrb[12].mxu0 %vm826_vm3, %v2030_v57  ;;  %5339 = vmatprep.mubr.msk.bf16.mxu1 %vm6836_vm0, %v6835_v1  ;;  %v2049_v57 = vor.u32 %v2048_v51, %v2047_v50  ;;  %v6773_v51 = vld [vmem:[%s8404_s2 + $0x30] sm:$0xff]  }
  0x38   : > { %5683 = vmatprep.mubr.msk.bf16.mxu0 %vm6836_vm0, %v6835_v1  ;;  %v723_v61 = vsel %vm647_vm1, %v718_v53, %v722_v56  ;;  %v726_v8 = vor.u32 %v7084_v31, %v722_v56 }
  0x39   : > { %v2050_v62 = vsel %vm2011_vm2, %v2045_v42, %v2049_v57  ;;  %v2426_v42 = vrot.slane %v6924_v5, 2 }
  0x3b   : > { %v2427_v50 = vsel %vm2424_vm4, %v2425_v41, %v2426_v42 }
  0x3e   : > { %5340 = vmatmul.mubr.msk.bf16.gmra.mrb[16].mxu1 %vm826_vm3, %v691_v6  ;;  %v2052_v6 = vrot.slane %v7123_v58, 2 }
  0x3f   : > { %5684 = vmatmul.mubr.msk.bf16.gmra.mrb[16].mxu0 %vm826_vm3, %v2034_v7  ;;  %5343 = vmatprep.mubr.msk.bf16.mxu1 %vm6836_vm0, %v6835_v1  ;;  %v7133_v7 = vld [vmem:[%s6915_s10 + $0x60] sm:$0xff]  }
  0x40   : > { %5687 = vmatprep.mubr.msk.bf16.mxu0 %vm6836_vm0, %v6835_v1  ;;  %v2053_v14 = vor.u32 %v2052_v6, %v2051_v63  ;;  %v7144_v15 = vshll.u32 %v7133_v7, 16  ;;  %v7147_v16 = vshrl.u32 %v7133_v7, 16  ;;  %v7202_v63 = vshrl.u32 %v7173_v40, 16 }
  0x42   : > { %8453 = vst [vmem:[#allocation5_spill] sm:$0xff] %v7144_v15  ;;  %8454 = vst [vmem:[#allocation6_spill] sm:$0xff] %v7147_v16  ;;  %v2055_v24 = vrot.slane %v7147_v16, 1  ;;  %v2056_v25 = vrot.slane %v7144_v15, 2  ;;  %v746_v37 = vrot.slane %v7144_v15, 1 }
  0x43   : > { %8457 = vst [vmem:[#allocation9_spill] sm:$0xff] %v7202_v63 }
  0x44   : > { %v7161_v29 = vor.u32 %v2056_v25, %v2055_v24  ;;  %v750_v53 = vor.u32 %v7147_v16, %v746_v37  ;;  %v424_v16 = vld [vmem:[%s7042_s20 + $0x4] sm:$0xf] }
  0x46   : > { %5344 = vmatmul.mubr.msk.bf16.gmra.mrb[20].mxu1 %vm826_vm3, %v699_v20  ;;  %v731_v20 = vsel %vm647_vm1, %v726_v8, %v730_v9  ;;  %8455 = vst [vmem:[#allocation7_spill] sm:$0xff] %v7161_v29 }
  0x47   : > { %5688 = vmatmul.mubr.msk.bf16.gmra.mrb[20].mxu0 %vm826_vm3, %v2038_v21  ;;  %5347 = vmatprep.mubr.msk.bf16.mxu1 %vm6836_vm0, %v6835_v1  ;;  %v2054_v21 = vsel %vm2011_vm2, %v2049_v57, %v2053_v14  ;;  %v7194_v57 = vld [vmem:[%s6915_s10 + $0x70] sm:$0xff]  }
  0x48   : > { %5691 = vmatprep.mubr.msk.bf16.mxu0 %vm6836_vm0, %v6835_v1  ;;  %v7205_v6 = vshll.u32 %v7194_v57, 16  ;;  %v7225_v25 = vshrl.u32 %v7194_v57, 16 }
  0x4a   : > { %8458 = vst [vmem:[#allocation10_spill] sm:$0xff] %v7205_v6  ;;  %8459 = vst [vmem:[#allocation11_spill] sm:$0xff] %v7225_v25 }
  0x4e   : > { %5348 = vmatmul.mubr.msk.bf16.gmra.mrb[24].mxu1 %vm826_vm3, %v707_v32  ;;  %v739_v32 = vsel %vm647_vm1, %v734_v27, %v738_v28 }
  0x4f   : > { %5692 = vmatmul.mubr.msk.bf16.gmra.mrb[24].mxu0 %vm826_vm3, %v2042_v35  ;;  %5351 = vmatprep.mubr.msk.bf16.mxu1 %vm6836_vm0, %v6835_v1  ;;  %v2058_v35 = vsel %vm2011_vm2, %v2053_v14, %v7161_v29  ;;  %v762_v14 = vrot.slane %v7205_v6, 1 }
  0x50   : > { %5695 = vmatprep.mubr.msk.bf16.mxu0 %vm6836_vm0, %v6835_v1 }
  0x56   : > { %5352 = vmatmul.mubr.msk.bf16.gmra.mrb[28].mxu1 %vm826_vm3, %v715_v48  ;;  %v747_v48 = vsel %vm647_vm1, %v742_v36, %v746_v37  ;;  %v7241_v36 = vld [vmem:[%s6915_s10 + $0x80] sm:$0xff]   ;;  %v2432_v37 = vrot.slane %v6979_v39, 2 }
  0x57   : > { %5696 = vmatmul.mubr.msk.bf16.gmra.mrb[28].mxu0 %vm826_vm3, %v2046_v49  ;;  %5355 = vmatprep.mubr.msk.bf16.mxu1 %vm6836_vm0, %v6835_v1  ;;  %v7181_v49 = vshll.u32 %v7173_v40, 16 }
  0x58   : > { %5699 = vmatprep.mubr.msk.bf16.mxu0 %vm6836_vm0, %v6835_v1 }
  0x59   : > { %8456 = vst [vmem:[#allocation8_spill] sm:$0xff] %v7181_v49  ;;  %v754_v56 = vrot.slane %v7181_v49, 1 }
  0x5b   : > { %v758_v9 = vor.u32 %v7202_v63, %v754_v56 }
  0x5d   : > { %v763_v24 = vsel %vm647_vm1, %v758_v9, %v762_v14  ;;  %v7271_v9 = vshrl.u32 %v7241_v36, 16 }
  0x5e   : > { %5356 = vmatmul.mubr.msk.bf16.gmra.mrb[32].mxu1 %vm826_vm3, %v723_v61  ;;  %v2428_v61 = vrot.slane %v6937_v12, 2 }
  0x5f   : > { %5700 = vmatmul.mubr.msk.bf16.gmra.mrb[32].mxu0 %vm826_vm3, %v2050_v62  ;;  %5359 = vmatprep.mubr.msk.bf16.mxu1 %vm6836_vm0, %v6835_v1  ;;  %v755_v62 = vsel %vm647_vm1, %v750_v53, %v754_v56  ;;  %v7264_v56 = vld [vmem:[%s6915_s10 + $0x88] sm:$0xff]   ;;  %8463 = vst [vmem:[#allocation15_spill] sm:$0xff] %v7271_v9 }
  0x60   : > { %5703 = vmatprep.mubr.msk.bf16.mxu0 %vm6836_vm0, %v6835_v1  ;;  %v7208_v8 = vsel %vm2424_vm4, %v2426_v42, %v2428_v61 }
  0x66   : > { %5360 = vmatmul.mubr.msk.bf16.gmra.mrb[36].mxu1 %vm826_vm3, %v731_v20  ;;  %v7218_v20 = vld [vmem:[%s6915_s10 + $0x78] sm:$0xff]  }
  0x67   : > { %5704 = vmatmul.mubr.msk.bf16.gmra.mrb[36].mxu0 %vm826_vm3, %v2054_v21  ;;  %5363 = vmatprep.mubr.msk.bf16.mxu1 %vm6836_vm0, %v6835_v1  ;;  %v2430_v21 = vrot.slane %v6948_v23, 2  ;;  %v7228_v27 = vshll.u32 %v7218_v20, 16  ;;  %v7248_v42 = vshrl.u32 %v7218_v20, 16 }
  0x68   : > { %5707 = vmatprep.mubr.msk.bf16.mxu0 %vm6836_vm0, %v6835_v1 }
  0x69   : > { %8460 = vst [vmem:[#allocation12_spill] sm:$0xff] %v7228_v27  ;;  %v7231_v28 = vsel %vm2424_vm4, %v2428_v61, %v2430_v21  ;;  %8461 = vst [vmem:[#allocation13_spill] sm:$0xff] %v7248_v42  ;;  %v2434_v61 = vrot.slane %v6998_v47, 2 }
  0x6e   : > { %5364 = vmatmul.mubr.msk.bf16.gmra.mrb[40].mxu1 %vm826_vm3, %v739_v32  ;;  %v766_v32 = vor.u32 %v7225_v25, %v762_v14  ;;  %v7274_v14 = vshll.u32 %v7264_v56, 16 }
  0x6f   : > { %5708 = vmatmul.mubr.msk.bf16.gmra.mrb[40].mxu0 %vm826_vm3, %v2058_v35  ;;  %5367 = vmatprep.mubr.msk.bf16.mxu1 %vm6836_vm0, %v6835_v1  ;;  %v770_v35 = vrot.slane %v7228_v27, 1 }
  0x70   : > { %5753 = vmatprep.mubr.msk.bf16.mxu0 %vm6836_vm0, %v6835_v1  ;;  %8464 = vst [vmem:[#allocation16_spill] sm:$0xff] %v7274_v14 }
  0x71   : > { %v771_v41 = vsel %vm647_vm1, %v766_v32, %v770_v35  ;;  %v786_v32 = vrot.slane %v7274_v14, 1  ;;  %v7310_v14 = vld [vmem:[%s6915_s10 + $0x98] sm:$0xff]  }
  0x76   : > { %5368 = vmatmul.mubr.msk.bf16.gmra.mrb[44].mxu1 %vm826_vm3, %v747_v48  ;;  %v7251_v48 = vshll.u32 %v7241_v36, 16 }
  0x77   : > { %5754 = vmatmul.mubr.msk.bf16.vlgmr.msra.gmra.mrb[0].mxu0 %vm826_vm3, %v2427_v50  ;;  %5371 = vmatprep.mubr.msk.bf16.mxu1 %vm6836_vm0, %v6835_v1  ;;  %v7254_v50 = vsel %vm2424_vm4, %v2430_v21, %v2432_v37  ;;  %v7277_v21 = vsel %vm2424_vm4, %v2432_v37, %v2434_v61  ;;  %v2436_v37 = vrot.slane %v7023_v60, 2 }
  0x78   : > { %5838 = vmatpush3.bf16.msra.mxu0 %v6773_v51  ;;  %5757 = vmatprep.mubr.msk.bf16.mxu0 %vm6836_vm0, %v6835_v1  ;;  %8462 = vst [vmem:[#allocation14_spill] sm:$0xff] %v7251_v48  ;;  %v774_v51 = vor.u32 %v7248_v42, %v770_v35  ;;  %v778_v53 = vrot.slane %v7251_v48, 1  ;;  %v7287_v35 = vld [vmem:[%s6915_s10 + $0x90] sm:$0xff]  }
  0x79   : > { %5923 = vmatprep.subr.bf16.mxu0 %v6835_v1  ;;  %v7300_v29 = vsel %vm2424_vm4, %v2434_v61, %v2436_v37  ;;  %v2438_v61 = vrot.slane %v7049_v13, 2  ;;  %v7317_v48 = vshrl.u32 %v7287_v35, 16 }
  0x7b   : > { %8467 = vst [vmem:[#allocation19_spill] sm:$0xff] %v7317_v48 }
  0x7e   : > { %5372 = vmatmul.mubr.msk.bf16.gmra.mrb[48].mxu1 %vm826_vm3, %v755_v62  ;;  %v779_v62 = vsel %vm647_vm1, %v774_v51, %v778_v53  ;;  %v7294_v51 = vshrl.u32 %v7264_v56, 16 }
  0x7f   : > { %5758 = vmatmul.mubr.msk.bf16.gmra.mrb[4].mxu0 %vm826_vm3, %v7208_v8  ;;  %5375 = vmatprep.mubr.msk.bf16.mxu1 %vm6836_vm0, %v6835_v1 }
  0x80   : > { %5761 = vmatprep.mubr.msk.bf16.mxu0 %vm6836_vm0, %v6835_v1  ;;  %8465 = vst [vmem:[#allocation17_spill] sm:$0xff] %v7294_v51 }
  0x86   : > { %5376 = vmatmul.mubr.msk.bf16.gmra.mrb[52].mxu1 %vm826_vm3, %v763_v24  ;;  %v782_v24 = vor.u32 %v7271_v9, %v778_v53  ;;  %v790_v53 = vor.u32 %v7294_v51, %v786_v32  ;;  %v7320_v9 = vshll.u32 %v7310_v14, 16  ;;  %v7333_v51 = vld [vmem:[%s6915_s10 + $0xa0] sm:$0xff]  }
  0x87   : > { %5762 = vmatmul.mubr.msk.bf16.gmra.mrb[8].mxu0 %vm826_vm3, %v7231_v28  ;;  %5379 = vmatprep.mubr.msk.bf16.mxu1 %vm6836_vm0, %v6835_v1  ;;  %v7343_v42 = vshll.u32 %v7333_v51, 16  ;;  %v7367_v25 = vshrl.u32 %v7333_v51, 16 }
  0x88   : > { %5765 = vmatprep.mubr.msk.bf16.mxu0 %vm6836_vm0, %v6835_v1  ;;  %8468 = vst [vmem:[#allocation20_spill] sm:$0xff] %v7320_v9 }
  0x89   : > { %8470 = vst [vmem:[#allocation22_spill] sm:$0xff] %v7343_v42  ;;  %8472 = vst [vmem:[#allocation24_spill] sm:$0xff] %v7367_v25 }
  0x8e   : > { %5380 = vmatmul.mubr.msk.bf16.gmra.mrb[56].mxu1 %vm826_vm3, %v771_v41  ;;  %v787_v41 = vsel %vm647_vm1, %v782_v24, %v786_v32  ;;  %v7323_v32 = vsel %vm2424_vm4, %v2436_v37, %v2438_v61  ;;  %v2440_v37 = vrot.slane %v7070_v26, 2 }
  0x8f   : > { %5766 = vmatmul.mubr.msk.bf16.gmra.mrb[12].mxu0 %vm826_vm3, %v7254_v50  ;;  %5383 = vmatprep.mubr.msk.bf16.mxu1 %vm6836_vm0, %v6835_v1 }
  0x90   : > { %5769 = vmatprep.mubr.msk.bf16.mxu0 %vm6836_vm0, %v6835_v1  ;;  %v7346_v6 = vsel %vm2424_vm4, %v2438_v61, %v2440_v37  ;;  %v2442_v61 = vrot.slane %v7091_v38, 2 }
  0x96   : > { %5384 = vmatmul.mubr.msk.bf16.gmra.mrb[60].mxu1 %vm826_vm3, %v779_v62  ;;  %v7297_v62 = vshll.u32 %v7287_v35, 16 }
  0x97   : > { %5770 = vmatmul.mubr.msk.bf16.gmra.mrb[16].mxu0 %vm826_vm3, %v7277_v21  ;;  %5387 = vmatprep.mubr.msk.bf16.mxu1 %vm6836_vm0, %v6835_v1 }
  0x98   : > { %5773 = vmatprep.mubr.msk.bf16.mxu0 %vm6836_vm0, %v6835_v1  ;;  %8466 = vst [vmem:[#allocation18_spill] sm:$0xff] %v7297_v62  ;;  %v794_v24 = vrot.slane %v7297_v62, 1  ;;  %v802_v62 = vrot.slane %v7320_v9, 1  ;;  %v810_v9 = vrot.slane %v7343_v42, 1 }
  0x9a   : > { %v814_v42 = vor.u32 %v7367_v25, %v810_v9 }
  0x9e   : > { %5388 = vmatmul.mubr.msk.bf16.gmra.mrb[64].mxu1 %vm826_vm3, %v787_v41  ;;  %v795_v41 = vsel %vm647_vm1, %v790_v53, %v794_v24  ;;  %v798_v53 = vor.u32 %v7317_v48, %v794_v24  ;;  %v7349_v24 = vld [vmem:[%s7042_s20] sm:$0xf] }
  0x9f   : > { %5774 = vmatmul.mubr.msk.bf16.gmra.mrb[20].mxu0 %vm826_vm3, %v7300_v29  ;;  %5391 = vmatprep.mubr.msk.bf16.mxu1 %vm6836_vm0, %v6835_v1  ;;  %v7360_v48 = vcombine.low %v7349_v24, %v7349_v24  ;;  %v7496_v58 = vcombine.low %v7349_v24, %v424_v16  ;;  %v7513_v16 = vld [vmem:[%s7042_s20 + $0x8] sm:$0xf] }
  0xa0   : > { %5777 = vmatprep.mubr.msk.bf16.mxu0 %vm6836_vm0, %v6835_v1  ;;  %v803_v27 = vsel %vm647_vm1, %v798_v53, %v802_v62 }
  0xa1   : > { %8471 = vst [vmem:[#allocation23_spill] sm:$0xff] %v7360_v48  ;;  %v816_v49 = vshll.u32 %v7360_v48, 16  ;;  %8473 = vst [vmem:[#allocation25_spill] sm:$0xff] %v7496_v58  ;;  %v7510_v59 = vrot.slane %v7496_v58, 2 }
  0xa6   : > { %5392 = vmatmul.mubr.msk.bf16.gmra.mrb[68].mxu1 %vm826_vm3, %v795_v41  ;;  %v7340_v41 = vshrl.u32 %v7310_v14, 16 }
  0xa7   : > { %5778 = vmatmul.mubr.msk.bf16.gmra.mrb[24].mxu0 %vm826_vm3, %v7323_v32  ;;  %5395 = vmatprep.mubr.msk.bf16.mxu1 %vm6836_vm0, %v6835_v1 }
  0xa8   : > { %5781 = vmatprep.mubr.msk.bf16.mxu0 %vm6836_vm0, %v6835_v1  ;;  %8469 = vst [vmem:[#allocation21_spill] sm:$0xff] %v7340_v41  ;;  %v806_v53 = vor.u32 %v7340_v41, %v802_v62  ;;  %v7371_v62 = vsel %vm2424_vm4, %v2440_v37, %v2442_v61  ;;  %v818_v41 = vrot.slane %v816_v49, 1  ;;  %v2446_v49 = vrot.slane %v7133_v7, 2 }
  0xaa   : > { %v819_v63 = vsel %vm647_vm1, %v814_v42, %v818_v41  ;;  %v6784_v42 = vld [vmem:[%s8404_s2 + $0x10] sm:$0xff]  }
  0xae   : > { %5396 = vmatmul.mubr.msk.bf16.gmra.mrb[72].mxu1 %vm826_vm3, %v803_v27  ;;  %v811_v27 = vsel %vm647_vm1, %v806_v53, %v810_v9  ;;  %v2444_v53 = vrot.slane %v7112_v52, 2 }
  0xaf   : > { %5782 = vmatmul.mubr.msk.bf16.gmra.mrb[28].mxu0 %vm826_vm3, %v7346_v6  ;;  %5399 = vmatprep.mubr.msk.bf16.mxu1 %vm6836_vm0, %v6835_v1 }
  0xb0   : > { %5785 = vmatprep.mubr.msk.bf16.mxu0 %vm6836_vm0, %v6835_v1  ;;  %v7384_v37 = vsel %vm2424_vm4, %v2442_v61, %v2444_v53  ;;  %v7395_v9 = vsel %vm2424_vm4, %v2444_v53, %v2446_v49  ;;  %v2450_v61 = vrot.slane %v7194_v57, 2  ;;  %v2452_v53 = vrot.slane %v7218_v20, 2 }
  0xb6   : > { %5400 = vmatmul.mubr.msk.bf16.gmra.mrb[76].mxu1 %vm826_vm3, %v811_v27 }
  0xb7   : > { %5786 = vmatmul.mubr.msk.bf16.gmra.mrb[32].mxu0 %vm826_vm3, %v7371_v62  ;;  %5403 = vmatprep.mubr.msk.bf16.mxu1 %vm6836_vm0, %v6835_v1 }
  0xb8   : > { %5789 = vmatprep.mubr.msk.bf16.mxu0 %vm6836_vm0, %v6835_v1 }
  0xbe   : > { %5404 = vmatmul.mubr.msk.bf16.gmra.mrb[80].mxu1 %vm826_vm3, %v819_v63  ;;  %v2448_v63 = vrot.slane %v7173_v40, 2 }
  0xbf   : > { %5790 = vmatmul.mubr.msk.bf16.gmra.mrb[36].mxu0 %vm826_vm3, %v7384_v37  ;;  %5409 = vmatprep.mubr.msk.bf16.mxu1 %vm6836_vm0, %v6835_v1 }
  0xc0   : > { %5793 = vmatprep.mubr.msk.bf16.mxu0 %vm6836_vm0, %v6835_v1  ;;  %v7411_v41 = vsel %vm2424_vm4, %v2446_v49, %v2448_v63  ;;  %v7423_v27 = vsel %vm2424_vm4, %v2448_v63, %v2450_v61  ;;  %v7435_v49 = vsel %vm2424_vm4, %v2450_v61, %v2452_v53  ;;  %v2456_v61 = vrot.slane %v7264_v56, 2 }
  0xc6   : > { %5410 = vmatmul.mubr.msk.bf16.vlgmr.msra.gmra.mrb[0].mxu1 %vm826_vm3, %v6918_v3 }
  0xc7   : > { %5794 = vmatmul.mubr.msk.bf16.gmra.mrb[40].mxu0 %vm826_vm3, %v7395_v9  ;;  %5413 = vmatprep.mubr.msk.bf16.mxu1 %vm6836_vm0, %v6835_v1 }
  0xc8   : > { %5797 = vmatprep.mubr.msk.bf16.mxu0 %vm6836_vm0, %v6835_v1  ;;  %5494 = vmatpush3.bf16.msra.mxu1 %v6784_v42  ;;  %v2454_v42 = vrot.slane %v7241_v36, 2 }
  0xc9   : > { %5579 = vmatprep.subr.bf16.mxu1 %v6835_v1 }
  0xca   : > { %v7447_v63 = vsel %vm2424_vm4, %v2452_v53, %v2454_v42  ;;  %v7459_v25 = vsel %vm2424_vm4, %v2454_v42, %v2456_v61  ;;  %v2458_v53 = vrot.slane %v7287_v35, 2  ;;  %v2460_v42 = vrot.slane %v7310_v14, 2 }
  0xcc   : > { %v7471_v48 = vsel %vm2424_vm4, %v2456_v61, %v2458_v53  ;;  %v7483_v15 = vsel %vm2424_vm4, %v2458_v53, %v2460_v42  ;;  %v2462_v61 = vrot.slane %v7333_v51, 2 }
  0xce   : > { %5414 = vmatmul.mubr.msk.bf16.gmra.mrb[4].mxu1 %vm826_vm3, %v6921_v4  ;;  %v7499_v53 = vsel %vm2424_vm4, %v2460_v42, %v2462_v61  ;;  %v7517_v24 = vsel %vm2424_vm4, %v2462_v61, %v7510_v59  ;;  %v7521_v42 = vcombine.low %v7513_v16, %v7513_v16 }
  0xcf   : > { %5798 = vmatmul.mubr.msk.bf16.gmra.mrb[44].mxu0 %vm826_vm3, %v7411_v41  ;;  %5417 = vmatprep.mubr.msk.bf16.mxu1 %vm6836_vm0, %v6835_v1 }
  0xd0   : > { %5801 = vmatprep.mubr.msk.bf16.mxu0 %vm6836_vm0, %v6835_v1  ;;  %v2466_v58 = vrot.slane %v7521_v42, 2 }
  0xd2   : > { %v2467_v61 = vsel %vm2424_vm4, %v7510_v59, %v2466_v58  ;;  %v1388_v58 = vrot.slane %v6921_v4, 1 }
  0xd6   : > { %5418 = vmatmul.mubr.msk.bf16.gmra.mrb[8].mxu1 %vm826_vm3, %v6924_v5 }
  0xd7   : > { %5802 = vmatmul.mubr.msk.bf16.gmra.mrb[48].mxu0 %vm826_vm3, %v7423_v27  ;;  %5421 = vmatprep.mubr.msk.bf16.mxu1 %vm6836_vm0, %v6835_v1 }
  0xd8   : > { %5805 = vmatprep.mubr.msk.bf16.mxu0 %vm6836_vm0, %v6835_v1 }
  0xde   : > { %5422 = vmatmul.mubr.msk.bf16.gmra.mrb[12].mxu1 %vm826_vm3, %v6937_v12 }
  0xdf   : > { %5806 = vmatmul.mubr.msk.bf16.gmra.mrb[52].mxu0 %vm826_vm3, %v7435_v49  ;;  %5425 = vmatprep.mubr.msk.bf16.mxu1 %vm6836_vm0, %v6835_v1 }
  0xe0   : > { %5809 = vmatprep.mubr.msk.bf16.mxu0 %vm6836_vm0, %v6835_v1 }
  0xe6   : > { %5426 = vmatmul.mubr.msk.bf16.gmra.mrb[16].mxu1 %vm826_vm3, %v6948_v23 }
  0xe7   : > { %5810 = vmatmul.mubr.msk.bf16.gmra.mrb[56].mxu0 %vm826_vm3, %v7447_v63  ;;  %5429 = vmatprep.mubr.msk.bf16.mxu1 %vm6836_vm0, %v6835_v1 }
  0xe8   : > { %5813 = vmatprep.mubr.msk.bf16.mxu0 %vm6836_vm0, %v6835_v1 }
  0xee   : > { %5430 = vmatmul.mubr.msk.bf16.gmra.mrb[20].mxu1 %vm826_vm3, %v6979_v39 }
  0xef   : > { %5814 = vmatmul.mubr.msk.bf16.gmra.mrb[60].mxu0 %vm826_vm3, %v7459_v25  ;;  %5433 = vmatprep.mubr.msk.bf16.mxu1 %vm6836_vm0, %v6835_v1 }
  0xf0   : > { %5817 = vmatprep.mubr.msk.bf16.mxu0 %vm6836_vm0, %v6835_v1 }
  0xf6   : > { %5434 = vmatmul.mubr.msk.bf16.gmra.mrb[24].mxu1 %vm826_vm3, %v6998_v47 }
  0xf7   : > { %5818 = vmatmul.mubr.msk.bf16.gmra.mrb[64].mxu0 %vm826_vm3, %v7471_v48  ;;  %5437 = vmatprep.mubr.msk.bf16.mxu1 %vm6836_vm0, %v6835_v1 }
  0xf8   : > { %5821 = vmatprep.mubr.msk.bf16.mxu0 %vm6836_vm0, %v6835_v1 }
  0xfe   : > { %5438 = vmatmul.mubr.msk.bf16.gmra.mrb[28].mxu1 %vm826_vm3, %v7023_v60 }
  0xff   : > { %5822 = vmatmul.mubr.msk.bf16.gmra.mrb[68].mxu0 %vm826_vm3, %v7483_v15  ;;  %5441 = vmatprep.mubr.msk.bf16.mxu1 %vm6836_vm0, %v6835_v1 }
 0x100   : > { %5825 = vmatprep.mubr.msk.bf16.mxu0 %vm6836_vm0, %v6835_v1 }
 0x106   : > { %5442 = vmatmul.mubr.msk.bf16.gmra.mrb[32].mxu1 %vm826_vm3, %v7049_v13 }
 0x107   : > { %5826 = vmatmul.mubr.msk.bf16.gmra.mrb[72].mxu0 %vm826_vm3, %v7499_v53  ;;  %5445 = vmatprep.mubr.msk.bf16.mxu1 %vm6836_vm0, %v6835_v1 }
 0x108   : > { %5829 = vmatprep.mubr.msk.bf16.mxu0 %vm6836_vm0, %v6835_v1 }
 0x10e   : > { %5446 = vmatmul.mubr.msk.bf16.gmra.mrb[36].mxu1 %vm826_vm3, %v7070_v26 }
 0x10f   : > { %5830 = vmatmul.mubr.msk.bf16.gmra.mrb[76].mxu0 %vm826_vm3, %v7517_v24  ;;  %5449 = vmatprep.mubr.msk.bf16.mxu1 %vm6836_vm0, %v6835_v1 }
 0x110   : > { %5833 = vmatprep.mubr.msk.bf16.mxu0 %vm6836_vm0, %v6835_v1 }
 0x116   : > { %5450 = vmatmul.mubr.msk.bf16.gmra.mrb[40].mxu1 %vm826_vm3, %v7091_v38 }
 0x117   : > { %5834 = vmatmul.mubr.msk.bf16.gmra.mrb[80].mxu0 %vm826_vm3, %v2467_v61  ;;  %5453 = vmatprep.mubr.msk.bf16.mxu1 %vm6836_vm0, %v6835_v1  ;;  %v3054_v61 = vrot.slane %v6942_v19, 3 }
 0x118   : > { %5839 = vmatprep.mubr.msk.bf16.mxu0 %vm6836_vm0, %v6835_v1 }
 0x11e   : > { %5454 = vmatmul.mubr.msk.bf16.gmra.mrb[44].mxu1 %vm826_vm3, %v7112_v52 }
 0x11f   : > { %5840 = vmatmul.mubr.msk.bf16.vlgmr.msra.gmra.mrb[0].mxu0 %vm826_vm3, %v7208_v8  ;;  %5457 = vmatprep.mubr.msk.bf16.mxu1 %vm6836_vm0, %v6835_v1 }
 0x120   : > { %5924 = vmatpush3.bf16.msra.mxu0 %v6786_v43  ;;  %5843 = vmatprep.mubr.msk.bf16.mxu0 %vm6836_vm0, %v6835_v1  ;;  %v1387_v43 = vrot.slane %v6918_v3, 1  ;;  %v1390_v3 = vrot.slane %v6924_v5, 1  ;;  %v1392_v5 = vrot.slane %v6937_v12, 1 }
 0x121   : > { %6009 = vmatprep.subr.bf16.mxu0 %v6835_v1 }
 0x122   : > { %v7641_v4 = vsel %vm1386_vm5, %v1388_v58, %v1390_v3  ;;  %v7653_v8 = vsel %vm1386_vm5, %v1390_v3, %v1392_v5 }
 0x126   : > { %5458 = vmatmul.mubr.msk.bf16.gmra.mrb[48].mxu1 %vm826_vm3, %v7133_v7 }
 0x127   : > { %5844 = vmatmul.mubr.msk.bf16.gmra.mrb[4].mxu0 %vm826_vm3, %v7231_v28  ;;  %5461 = vmatprep.mubr.msk.bf16.mxu1 %vm6836_vm0, %v6835_v1  ;;  %v1394_v28 = vrot.slane %v6948_v23, 1 }
 0x128   : > { %5847 = vmatprep.mubr.msk.bf16.mxu0 %vm6836_vm0, %v6835_v1 }
 0x129   : > { %v7665_v12 = vsel %vm1386_vm5, %v1392_v5, %v1394_v28  ;;  %v3062_v5 = vrot.slane %v6991_v44, 3  ;;  %v3065_v44 = vrot.slane %v7016_v55, 2 }
 0x12e   : > { %5462 = vmatmul.mubr.msk.bf16.gmra.mrb[52].mxu1 %vm826_vm3, %v7173_v40 }
 0x12f   : > { %5848 = vmatmul.mubr.msk.bf16.gmra.mrb[8].mxu0 %vm826_vm3, %v7254_v50  ;;  %5465 = vmatprep.mubr.msk.bf16.mxu1 %vm6836_vm0, %v6835_v1  ;;  %v1396_v50 = vrot.slane %v6979_v39, 1 }
 0x130   : > { %5851 = vmatprep.mubr.msk.bf16.mxu0 %vm6836_vm0, %v6835_v1 }
 0x131   : > { %v7677_v23 = vsel %vm1386_vm5, %v1394_v28, %v1396_v50 }
 0x136   : > { %5466 = vmatmul.mubr.msk.bf16.gmra.mrb[56].mxu1 %vm826_vm3, %v7194_v57 }
 0x137   : > { %5852 = vmatmul.mubr.msk.bf16.gmra.mrb[12].mxu0 %vm826_vm3, %v7277_v21  ;;  %5469 = vmatprep.mubr.msk.bf16.mxu1 %vm6836_vm0, %v6835_v1  ;;  %v1398_v21 = vrot.slane %v6998_v47, 1 }
 0x138   : > { %5855 = vmatprep.mubr.msk.bf16.mxu0 %vm6836_vm0, %v6835_v1 }
 0x139   : > { %v7689_v39 = vsel %vm1386_vm5, %v1396_v50, %v1398_v21 }
 0x13e   : > { %5470 = vmatmul.mubr.msk.bf16.gmra.mrb[60].mxu1 %vm826_vm3, %v7218_v20 }
 0x13f   : > { %5856 = vmatmul.mubr.msk.bf16.gmra.mrb[16].mxu0 %vm826_vm3, %v7300_v29  ;;  %5473 = vmatprep.mubr.msk.bf16.mxu1 %vm6836_vm0, %v6835_v1  ;;  %v1389_v29 = vsel %vm1386_vm5, %v1387_v43, %v1388_v58  ;;  %v3057_v58 = vrot.slane %v6969_v34, 2  ;;  %v3061_v34 = vrot.slane %v6994_v45, 2 }
 0x140   : > { %5859 = vmatprep.mubr.msk.bf16.mxu0 %vm6836_vm0, %v6835_v1 }
 0x141   : > { %v3063_v28 = vor.u32 %v3062_v5, %v3061_v34  ;;  %v8478_v34 = vld [vmem:[#allocation5_spill] sm:$0xff] }
 0x142   : > { %v3090_v5 = vrot.slane %v8478_v34, 3  ;;  %v8492_v34 = vld [vmem:[#allocation21_spill] sm:$0xff] }
 0x146   : > { %5474 = vmatmul.mubr.msk.bf16.gmra.mrb[64].mxu1 %vm826_vm3, %v7241_v36 }
 0x147   : > { %5860 = vmatmul.mubr.msk.bf16.gmra.mrb[20].mxu0 %vm826_vm3, %v7323_v32  ;;  %5477 = vmatprep.mubr.msk.bf16.mxu1 %vm6836_vm0, %v6835_v1 }
 0x148   : > { %5863 = vmatprep.mubr.msk.bf16.mxu0 %vm6836_vm0, %v6835_v1 }
 0x14e   : > { %5478 = vmatmul.mubr.msk.bf16.gmra.mrb[68].mxu1 %vm826_vm3, %v7264_v56 }
 0x14f   : > { %5864 = vmatmul.mubr.msk.bf16.gmra.mrb[24].mxu0 %vm826_vm3, %v7346_v6  ;;  %5481 = vmatprep.mubr.msk.bf16.mxu1 %vm6836_vm0, %v6835_v1  ;;  %v6787_v6 = vld [vmem:[%s8404_s2 + $0x18] sm:$0xff]  }
 0x150   : > { %5867 = vmatprep.mubr.msk.bf16.mxu0 %vm6836_vm0, %v6835_v1 }
 0x156   : > { %5482 = vmatmul.mubr.msk.bf16.gmra.mrb[72].mxu1 %vm826_vm3, %v7287_v35 }
 0x157   : > { %5868 = vmatmul.mubr.msk.bf16.gmra.mrb[28].mxu0 %vm826_vm3, %v7371_v62  ;;  %5485 = vmatprep.mubr.msk.bf16.mxu1 %vm6836_vm0, %v6835_v1 }
 0x158   : > { %5871 = vmatprep.mubr.msk.bf16.mxu0 %vm6836_vm0, %v6835_v1 }
 0x15e   : > { %5486 = vmatmul.mubr.msk.bf16.gmra.mrb[76].mxu1 %vm826_vm3, %v7310_v14 }
 0x15f   : > { %5872 = vmatmul.mubr.msk.bf16.gmra.mrb[32].mxu0 %vm826_vm3, %v7384_v37  ;;  %5489 = vmatprep.mubr.msk.bf16.mxu1 %vm6836_vm0, %v6835_v1 }
 0x160   : > { %5875 = vmatprep.mubr.msk.bf16.mxu0 %vm6836_vm0, %v6835_v1 }
 0x166   : > { %5490 = vmatmul.mubr.msk.bf16.gmra.mrb[80].mxu1 %vm826_vm3, %v7333_v51 }
 0x167   : > { %5876 = vmatmul.mubr.msk.bf16.gmra.mrb[36].mxu0 %vm826_vm3, %v7395_v9  ;;  %5495 = vmatprep.mubr.msk.bf16.mxu1 %vm6836_vm0, %v6835_v1 }
 0x168   : > { %5879 = vmatprep.mubr.msk.bf16.mxu0 %vm6836_vm0, %v6835_v1 }
 0x16e   : > { %5496 = vmatmul.mubr.msk.bf16.vlgmr.msra.gmra.mrb[0].mxu1 %vm826_vm3, %v1389_v29  ;;  %v3058_v29 = vrot.slane %v6966_v33, 3 }
 0x16f   : > { %5880 = vmatmul.mubr.msk.bf16.gmra.mrb[40].mxu0 %vm826_vm3, %v7411_v41  ;;  %5499 = vmatprep.mubr.msk.bf16.mxu1 %vm6836_vm0, %v6835_v1  ;;  %v7745_v41 = vld [vmem:[%s7042_s20 + $0x10] ss:$0 sps:$4 sm:$0xff]  }
 0x170   : > { %5883 = vmatprep.mubr.msk.bf16.mxu0 %vm6836_vm0, %v6835_v1  ;;  %5580 = vmatpush3.bf16.msra.mxu1 %v6787_v6  ;;  %v3059_v6 = vor.u32 %v3058_v29, %v3057_v58 }
 0x171   : > { %6095 = vmatprep.subr.bf16.mxu1 %v6835_v1 }
 0x172   : > { %v3064_v45 = vsel %vm3049_vm6, %v3059_v6, %v3063_v28 }
 0x176   : > { %5500 = vmatmul.mubr.msk.bf16.gmra.mrb[4].mxu1 %vm826_vm3, %v7641_v4 }
 0x177   : > { %5884 = vmatmul.mubr.msk.bf16.gmra.mrb[44].mxu0 %vm826_vm3, %v7423_v27  ;;  %5503 = vmatprep.mubr.msk.bf16.mxu1 %vm6836_vm0, %v6835_v1 }
 0x178   : > { %5887 = vmatprep.mubr.msk.bf16.mxu0 %vm6836_vm0, %v6835_v1 }
 0x17e   : > { %5504 = vmatmul.mubr.msk.bf16.gmra.mrb[8].mxu1 %vm826_vm3, %v7653_v8 }
 0x17f   : > { %5888 = vmatmul.mubr.msk.bf16.gmra.mrb[48].mxu0 %vm826_vm3, %v7435_v49  ;;  %5507 = vmatprep.mubr.msk.bf16.mxu1 %vm6836_vm0, %v6835_v1  ;;  %v2789_v49 = vrot.slane %v7745_v41, 2 }
 0x180   : > { %5891 = vmatprep.mubr.msk.bf16.mxu0 %vm6836_vm0, %v6835_v1 }
 0x186   : > { %5508 = vmatmul.mubr.msk.bf16.gmra.mrb[12].mxu1 %vm826_vm3, %v7665_v12 }
 0x187   : > { %5892 = vmatmul.mubr.msk.bf16.gmra.mrb[52].mxu0 %vm826_vm3, %v7447_v63  ;;  %5511 = vmatprep.mubr.msk.bf16.mxu1 %vm6836_vm0, %v6835_v1 }
 0x188   : > { %5895 = vmatprep.mubr.msk.bf16.mxu0 %vm6836_vm0, %v6835_v1 }
 0x18e   : > { %5512 = vmatmul.mubr.msk.bf16.gmra.mrb[16].mxu1 %vm826_vm3, %v7677_v23 }
 0x18f   : > { %5896 = vmatmul.mubr.msk.bf16.gmra.mrb[56].mxu0 %vm826_vm3, %v7459_v25  ;;  %5515 = vmatprep.mubr.msk.bf16.mxu1 %vm6836_vm0, %v6835_v1  ;;  %v1400_v25 = vrot.slane %v7023_v60, 1 }
 0x190   : > { %5899 = vmatprep.mubr.msk.bf16.mxu0 %vm6836_vm0, %v6835_v1 }
 0x191   : > { %v7701_v47 = vsel %vm1386_vm5, %v1398_v21, %v1400_v25  ;;  %v3066_v21 = vrot.slane %v7013_v54, 3  ;;  %v3069_v54 = vrot.slane %v7037_v2, 2 }
 0x196   : > { %5516 = vmatmul.mubr.msk.bf16.gmra.mrb[20].mxu1 %vm826_vm3, %v7689_v39 }
 0x197   : > { %5900 = vmatmul.mubr.msk.bf16.gmra.mrb[60].mxu0 %vm826_vm3, %v7471_v48  ;;  %5519 = vmatprep.mubr.msk.bf16.mxu1 %vm6836_vm0, %v6835_v1  ;;  %v1402_v48 = vrot.slane %v7049_v13, 1  ;;  %v426_v13 = vld [vmem:[%s7042_s20 + $0xc] sm:$0xf] }
 0x198   : > { %5903 = vmatprep.mubr.msk.bf16.mxu0 %vm6836_vm0, %v6835_v1  ;;  %v7729_v62 = vcombine.low %v7513_v16, %v426_v13  ;;  %v3051_v16 = vrot.slane %v6931_v10, 3 }
 0x199   : > { %v7713_v60 = vsel %vm1386_vm5, %v1400_v25, %v1402_v48  ;;  %v3067_v25 = vor.u32 %v3066_v21, %v3065_v44  ;;  %v8480_v21 = vld [vmem:[#allocation9_spill] sm:$0xff] }
 0x19a   : > { %v2787_v37 = vrot.slane %v7729_v62, 2 }
 0x19b   : > { %v3068_v55 = vsel %vm3049_vm6, %v3063_v28, %v3067_v25 }
 0x19c   : > { %v2788_v27 = vsel %vm2424_vm4, %v7510_v59, %v2787_v37  ;;  %v2790_v59 = vsel %vm2424_vm4, %v2787_v37, %v2789_v49  ;;  %v3074_v37 = vrot.slane %v7060_v17, 3  ;;  %v3077_v17 = vrot.slane %v7084_v31, 2 }
 0x19d   : > { %v3078_v49 = vrot.slane %v7081_v30, 3  ;;  %v3081_v30 = vrot.slane %v7105_v46, 2 }
 0x19e   : > { %5520 = vmatmul.mubr.msk.bf16.gmra.mrb[24].mxu1 %vm826_vm3, %v7701_v47 }
 0x19f   : > { %5904 = vmatmul.mubr.msk.bf16.gmra.mrb[64].mxu0 %vm826_vm3, %v7483_v15  ;;  %5523 = vmatprep.mubr.msk.bf16.mxu1 %vm6836_vm0, %v6835_v1  ;;  %v1404_v15 = vrot.slane %v7070_v26, 1  ;;  %v1406_v26 = vrot.slane %v7091_v38, 1  ;;  %v1408_v38 = vrot.slane %v7112_v52, 1  ;;  %v1410_v52 = vrot.slane %v7133_v7, 1 }
 0x1a0   : > { %5907 = vmatprep.mubr.msk.bf16.mxu0 %vm6836_vm0, %v6835_v1  ;;  %v1412_v7 = vrot.slane %v7173_v40, 1  ;;  %v1414_v40 = vrot.slane %v7194_v57, 1  ;;  %v1416_v57 = vrot.slane %v7218_v20, 1  ;;  %v1418_v20 = vrot.slane %v7241_v36, 1 }
 0x1a1   : > { %v7726_v32 = vsel %vm1386_vm5, %v1402_v48, %v1404_v15  ;;  %v7742_v9 = vsel %vm1386_vm5, %v1404_v15, %v1406_v26  ;;  %v7759_v63 = vsel %vm1386_vm5, %v1406_v26, %v1408_v38  ;;  %v7775_v10 = vsel %vm1386_vm5, %v1408_v38, %v1410_v52 }
 0x1a2   : > { %v7792_v3 = vsel %vm1386_vm5, %v1410_v52, %v1412_v7  ;;  %v7806_v50 = vsel %vm1386_vm5, %v1412_v7, %v1414_v40  ;;  %v7820_v48 = vsel %vm1386_vm5, %v1414_v40, %v1416_v57  ;;  %v3070_v15 = vrot.slane %v7034_v0, 3 }
 0x1a3   : > { %v7834_v26 = vsel %vm1386_vm5, %v1416_v57, %v1418_v20  ;;  %v3073_v0 = vrot.slane %v7063_v18, 2  ;;  %v1420_v36 = vrot.slane %v7264_v56, 1  ;;  %v1422_v56 = vrot.slane %v7287_v35, 1 }
 0x1a4   : > { %v3071_v13 = vor.u32 %v3070_v15, %v3069_v54  ;;  %v1424_v35 = vrot.slane %v7310_v14, 1  ;;  %v7887_v14 = vrot.slane %v7333_v51, 1  ;;  %v8479_v51 = vld [vmem:[#allocation23_spill] sm:$0xff]  ;;  %v3093_v57 = vrot.slane %v8480_v21, 2 }
 0x1a5   : > { %v7848_v38 = vsel %vm1386_vm5, %v1418_v20, %v1420_v36  ;;  %v1428_v40 = vrot.slane %v8479_v51, 1  ;;  %v8482_v20 = vld [vmem:[#allocation11_spill] sm:$0xff]  ;;  %v8493_v51 = vld [vmem:[#allocation20_spill] sm:$0xff] }
 0x1a6   : > { %5524 = vmatmul.mubr.msk.bf16.gmra.mrb[28].mxu1 %vm826_vm3, %v7713_v60  ;;  %v3072_v2 = vsel %vm3049_vm6, %v3067_v25, %v3071_v13  ;;  %v7876_v52 = vsel %vm1386_vm5, %v1422_v56, %v1424_v35  ;;  %v7893_v29 = vsel %vm1386_vm5, %v1424_v35, %v7887_v14  ;;  %v8481_v25 = vld [vmem:[#allocation8_spill] sm:$0xff] }
 0x1a7   : > { %5908 = vmatmul.mubr.msk.bf16.gmra.mrb[68].mxu0 %vm826_vm3, %v7499_v53  ;;  %5527 = vmatprep.mubr.msk.bf16.mxu1 %vm6836_vm0, %v6835_v1  ;;  %v3050_v53 = vrot.slane %v6934_v11, 2 }
 0x1a8   : > { %5911 = vmatprep.mubr.msk.bf16.mxu0 %vm6836_vm0, %v6835_v1 }
 0x1a9   : > { %v3052_v11 = vor.u32 %v3051_v16, %v3050_v53  ;;  %v7862_v53 = vsel %vm1386_vm5, %v1420_v36, %v1422_v56  ;;  %v8474_v16 = vld [vmem:[#allocation2_spill] sm:$0xff] }
 0x1ae   : > { %5528 = vmatmul.mubr.msk.bf16.gmra.mrb[32].mxu1 %vm826_vm3, %v7726_v32 }
 0x1af   : > { %5912 = vmatmul.mubr.msk.bf16.gmra.mrb[72].mxu0 %vm826_vm3, %v7517_v24  ;;  %5531 = vmatprep.mubr.msk.bf16.mxu1 %vm6836_vm0, %v6835_v1  ;;  %v3053_v24 = vrot.slane %v6945_v22, 2  ;;  %v6790_v22 = vld [vmem:[%s8404_s2 + $0x40] sm:$0xff]  }
 0x1b0   : > { %5915 = vmatprep.mubr.msk.bf16.mxu0 %vm6836_vm0, %v6835_v1 }
 0x1b1   : > { %v3055_v43 = vor.u32 %v3054_v61, %v3053_v24  ;;  %v3082_v24 = vrot.slane %v8474_v16, 3  ;;  %v8487_v16 = vld [vmem:[#allocation14_spill] sm:$0xff] }
 0x1b3   : > { %v3056_v19 = vsel %vm3049_vm6, %v3052_v11, %v3055_v43  ;;  %v3060_v33 = vsel %vm3049_vm6, %v3055_v43, %v3059_v6  ;;  %v3083_v61 = vor.u32 %v3082_v24, %v3081_v30  ;;  %v8475_v11 = vld [vmem:[#allocation4_spill] sm:$0xff]  ;;  %v8477_v6 = vld [vmem:[#allocation6_spill] sm:$0xff]  ;;  %v3106_v24 = vrot.slane %v8487_v16, 3 }
 0x1b4   : > { %v3085_v43 = vrot.slane %v8475_v11, 2  ;;  %v8489_v11 = vld [vmem:[#allocation16_spill] sm:$0xff] }
 0x1b6   : > { %5532 = vmatmul.mubr.msk.bf16.gmra.mrb[36].mxu1 %vm826_vm3, %v7742_v9 }
 0x1b7   : > { %5916 = vmatmul.mubr.msk.bf16.gmra.mrb[76].mxu0 %vm826_vm3, %v2788_v27  ;;  %5535 = vmatprep.mubr.msk.bf16.mxu1 %vm6836_vm0, %v6835_v1  ;;  %v3075_v27 = vor.u32 %v3074_v37, %v3073_v0  ;;  %v6791_v37 = vld [vmem:[%s8404_s2 + $0x20] sm:$0xff]  }
 0x1b8   : > { %5919 = vmatprep.mubr.msk.bf16.mxu0 %vm6836_vm0, %v6835_v1 }
 0x1b9   : > { %v3076_v18 = vsel %vm3049_vm6, %v3071_v13, %v3075_v27  ;;  %v3097_v13 = vrot.slane %v8482_v20, 2 }
 0x1be   : > { %5536 = vmatmul.mubr.msk.bf16.gmra.mrb[40].mxu1 %vm826_vm3, %v7759_v63 }
 0x1bf   : > { %5920 = vmatmul.mubr.msk.bf16.gmra.mrb[80].mxu0 %vm826_vm3, %v2790_v59  ;;  %5539 = vmatprep.mubr.msk.bf16.mxu1 %vm6836_vm0, %v6835_v1  ;;  %v3079_v59 = vor.u32 %v3078_v49, %v3077_v17  ;;  %v8485_v49 = vld [vmem:[#allocation12_spill] sm:$0xff] }
 0x1c0   : > { %5925 = vmatprep.mubr.msk.bf16.mxu0 %vm6836_vm0, %v6835_v1 }
 0x1c1   : > { %v3080_v31 = vsel %vm3049_vm6, %v3075_v27, %v3079_v59  ;;  %v3084_v46 = vsel %vm3049_vm6, %v3079_v59, %v3083_v61 }
 0x1c6   : > { %5540 = vmatmul.mubr.msk.bf16.gmra.mrb[44].mxu1 %vm826_vm3, %v7775_v10 }
 0x1c7   : > { %5926 = vmatmul.mubr.msk.bf16.vlgmr.msra.gmra.mrb[0].mxu0 %vm826_vm3, %v3056_v19  ;;  %5543 = vmatprep.mubr.msk.bf16.mxu1 %vm6836_vm0, %v6835_v1  ;;  %v8476_v19 = vld [vmem:[#allocation3_spill] sm:$0xff] }
 0x1c8   : > { %6010 = vmatpush3.bf16.msra.mxu0 %v6790_v22  ;;  %5929 = vmatprep.mubr.msk.bf16.mxu0 %vm6836_vm0, %v6835_v1  ;;  %v3086_v22 = vrot.slane %v8476_v19, 3 }
 0x1ca   : > { %v3087_v58 = vor.u32 %v3086_v22, %v3085_v43  ;;  %v3110_v43 = vrot.slane %v8489_v11, 3  ;;  %v8490_v22 = vld [vmem:[#allocation19_spill] sm:$0xff] }
 0x1cc   : > { %v3088_v7 = vsel %vm3049_vm6, %v3083_v61, %v3087_v58  ;;  %v8488_v61 = vld [vmem:[#allocation17_spill] sm:$0xff] }
 0x1ce   : > { %5544 = vmatmul.mubr.msk.bf16.gmra.mrb[48].mxu1 %vm826_vm3, %v7792_v3 }
 0x1cf   : > { %5930 = vmatmul.mubr.msk.bf16.gmra.mrb[4].mxu0 %vm826_vm3, %v3060_v33  ;;  %5547 = vmatprep.mubr.msk.bf16.mxu1 %vm6836_vm0, %v6835_v1  ;;  %v3089_v33 = vrot.slane %v8477_v6, 2 }
 0x1d0   : > { %5933 = vmatprep.mubr.msk.bf16.mxu0 %vm6836_vm0, %v6835_v1 }
 0x1d1   : > { %v3091_v28 = vor.u32 %v3090_v5, %v3089_v33  ;;  %v3117_v5 = vrot.slane %v8492_v34, 2 }
 0x1d3   : > { %v3092_v44 = vsel %vm3049_vm6, %v3087_v58, %v3091_v28  ;;  %v3113_v58 = vrot.slane %v8490_v22, 2 }
 0x1d6   : > { %5548 = vmatmul.mubr.msk.bf16.gmra.mrb[52].mxu1 %vm826_vm3, %v7806_v50 }
 0x1d7   : > { %5934 = vmatmul.mubr.msk.bf16.gmra.mrb[8].mxu0 %vm826_vm3, %v3064_v45  ;;  %5551 = vmatprep.mubr.msk.bf16.mxu1 %vm6836_vm0, %v6835_v1  ;;  %v1429_v45 = vsel %vm1386_vm5, %v7887_v14, %v1428_v40  ;;  %v3118_v40 = vrot.slane %v8493_v51, 3 }
 0x1d8   : > { %5937 = vmatprep.mubr.msk.bf16.mxu0 %vm6836_vm0, %v6835_v1 }
 0x1de   : > { %5552 = vmatmul.mubr.msk.bf16.gmra.mrb[56].mxu1 %vm826_vm3, %v7820_v48 }
 0x1df   : > { %5938 = vmatmul.mubr.msk.bf16.gmra.mrb[12].mxu0 %vm826_vm3, %v3068_v55  ;;  %5555 = vmatprep.mubr.msk.bf16.mxu1 %vm6836_vm0, %v6835_v1  ;;  %v3094_v55 = vrot.slane %v8481_v25, 3 }
 0x1e0   : > { %5941 = vmatprep.mubr.msk.bf16.mxu0 %vm6836_vm0, %v6835_v1 }
 0x1e1   : > { %v3095_v54 = vor.u32 %v3094_v55, %v3093_v57  ;;  %v8494_v57 = vld [vmem:[#allocation24_spill] sm:$0xff] }
 0x1e2   : > { %v3121_v55 = vrot.slane %v8494_v57, 2 }
 0x1e3   : > { %v3096_v15 = vsel %vm3049_vm6, %v3091_v28, %v3095_v54  ;;  %v6837_v28 = vmov 0  }
 0x1e4   : > { %6754 = vset.pattern.permute.xlu0 %v6837_v28  ;;  %6755 = vset.pattern.permute.xlu1 %v6837_v28  ;;  %v4040_v28 = vld [vmem:[%s7988_s18 + $0x60] sm:$0xff] }
 0x1e6   : > { %5556 = vmatmul.mubr.msk.bf16.gmra.mrb[60].mxu1 %vm826_vm3, %v7834_v26 }
 0x1e7   : > { %5942 = vmatmul.mubr.msk.bf16.gmra.mrb[16].mxu0 %vm826_vm3, %v3072_v2  ;;  %5559 = vmatprep.mubr.msk.bf16.mxu1 %vm6836_vm0, %v6835_v1  ;;  %v8483_v2 = vld [vmem:[#allocation10_spill] sm:$0xff] }
 0x1e8   : > { %5945 = vmatprep.mubr.msk.bf16.mxu0 %vm6836_vm0, %v6835_v1  ;;  %v3098_v0 = vrot.slane %v8483_v2, 3 }
 0x1ea   : > { %v3099_v36 = vor.u32 %v3098_v0, %v3097_v13  ;;  %v4029_v13 = vld [vmem:[%s7988_s18 + $0x8] sm:$0xff]  ;;  %v4031_v0 = vld [vmem:[%s7988_s18 + $0x18] sm:$0xff] }
 0x1ec   : > { %v3100_v27 = vsel %vm3049_vm6, %v3095_v54, %v3099_v36  ;;  %v8495_v54 = vld [vmem:[#allocation22_spill] sm:$0xff] }
 0x1ee   : > { %5560 = vmatmul.mubr.msk.bf16.gmra.mrb[64].mxu1 %vm826_vm3, %v7848_v38 }
 0x1ef   : > { %5946 = vmatmul.mubr.msk.bf16.gmra.mrb[20].mxu0 %vm826_vm3, %v3076_v18  ;;  %5563 = vmatprep.mubr.msk.bf16.mxu1 %vm6836_vm0, %v6835_v1  ;;  %v8484_v18 = vld [vmem:[#allocation13_spill] sm:$0xff] }
 0x1f0   : > { %5949 = vmatprep.mubr.msk.bf16.mxu0 %vm6836_vm0, %v6835_v1  ;;  %v3101_v17 = vrot.slane %v8484_v18, 2 }
 0x1f6   : > { %5564 = vmatmul.mubr.msk.bf16.gmra.mrb[68].mxu1 %vm826_vm3, %v7862_v53 }
 0x1f7   : > { %5950 = vmatmul.mubr.msk.bf16.gmra.mrb[24].mxu0 %vm826_vm3, %v3080_v31  ;;  %5567 = vmatprep.mubr.msk.bf16.mxu1 %vm6836_vm0, %v6835_v1  ;;  %v8486_v31 = vld [vmem:[#allocation15_spill] sm:$0xff] }
 0x1f8   : > { %5953 = vmatprep.mubr.msk.bf16.mxu0 %vm6836_vm0, %v6835_v1  ;;  %v3105_v30 = vrot.slane %v8486_v31, 2 }
 0x1fe   : > { %5568 = vmatmul.mubr.msk.bf16.gmra.mrb[72].mxu1 %vm826_vm3, %v7876_v52 }
 0x1ff   : > { %5954 = vmatmul.mubr.msk.bf16.gmra.mrb[28].mxu0 %vm826_vm3, %v3084_v46  ;;  %5571 = vmatprep.mubr.msk.bf16.mxu1 %vm6836_vm0, %v6835_v1  ;;  %v3109_v46 = vrot.slane %v8488_v61, 2 }
 0x200   : > { %5957 = vmatprep.mubr.msk.bf16.mxu0 %vm6836_vm0, %v6835_v1 }
 0x206   : > { %5572 = vmatmul.mubr.msk.bf16.gmra.mrb[76].mxu1 %vm826_vm3, %v7893_v29 }
 0x207   : > { %5958 = vmatmul.mubr.msk.bf16.gmra.mrb[32].mxu0 %vm826_vm3, %v3088_v7  ;;  %5575 = vmatprep.mubr.msk.bf16.mxu1 %vm6836_vm0, %v6835_v1  ;;  %v8491_v7 = vld [vmem:[#allocation18_spill] sm:$0xff] }
 0x208   : > { %5961 = vmatprep.mubr.msk.bf16.mxu0 %vm6836_vm0, %v6835_v1  ;;  %v3114_v6 = vrot.slane %v8491_v7, 3 }
 0x20e   : > { %5576 = vmatmul.mubr.msk.bf16.gmra.mrb[80].mxu1 %vm826_vm3, %v1429_v45  ;;  %v4030_v45 = vld [vmem:[%s7988_s18 + $0x10] sm:$0xff] }
 0x20f   : > { %5962 = vmatmul.mubr.msk.bf16.gmra.mrb[36].mxu0 %vm826_vm3, %v3092_v44  ;;  %5581 = vmatprep.mubr.msk.bf16.mxu1 %vm6836_vm0, %v6835_v1 }
 0x210   : > { %5965 = vmatprep.mubr.msk.bf16.mxu0 %vm6836_vm0, %v6835_v1  ;;  %4082 = vperm.xlu1 %6755, %v4030_v45  }
 0x214   : > { %4087 = vperm.xlu1 %6755, %v4031_v0   ;;  %v4044_v0 = vld [vmem:[%s7988_s18 + $0x80] sm:$0xff] }
 0x216   : > { %5582 = vmatmul.mubr.msk.bf16.vlgmr.msra.gmra.mrb[0].mxu1 %vm826_vm3, %v7641_v4  ;;  %v3102_v4 = vrot.slane %v8485_v49, 3 }
 0x217   : > { %5966 = vmatmul.mubr.msk.bf16.gmra.mrb[40].mxu0 %vm826_vm3, %v3096_v15  ;;  %5585 = vmatprep.mubr.msk.bf16.mxu1 %vm6836_vm0, %v6835_v1  ;;  %v3122_v15 = vrot.slane %v8495_v54, 3 }
 0x218   : > { %5969 = vmatprep.mubr.msk.bf16.mxu0 %vm6836_vm0, %v6835_v1  ;;  %6096 = vmatpush3.bf16.msra.mxu1 %v6791_v37  ;;  %v3103_v56 = vor.u32 %v3102_v4, %v3101_v17  ;;  %v4032_v4 = vld [vmem:[%s7988_s18 + $0x20] sm:$0xff] }
 0x219   : > { %v3123_v37 = vor.u32 %v3122_v15, %v3121_v55  ;;  %v4042_v55 = vld [vmem:[%s7988_s18 + $0x70] sm:$0xff]  ;;  %v4043_v15 = vld [vmem:[%s7988_s18 + $0x78] sm:$0xff] }
 0x21a   : > { %v3104_v59 = vsel %vm3049_vm6, %v3099_v36, %v3103_v56  ;;  %v8496_v36 = vld [vmem:[#allocation25_spill] sm:$0xff] }
 0x21b   : > { %v2095_v17 = vshll.u32 %v8496_v36, 16 }
 0x21e   : > { %5586 = vmatmul.mubr.msk.bf16.gmra.mrb[4].mxu1 %vm826_vm3, %v7653_v8  ;;  %v3107_v8 = vor.u32 %v3106_v24, %v3105_v30  ;;  %v3126_v30 = vrot.slane %v2095_v17, 3  ;;  %v4034_v24 = vld [vmem:[%s7988_s18 + $0x30] sm:$0xff] }
 0x21f   : > { %5970 = vmatmul.mubr.msk.bf16.gmra.mrb[44].mxu0 %vm826_vm3, %v3100_v27  ;;  %5589 = vmatprep.mubr.msk.bf16.mxu1 %vm6836_vm0, %v6835_v1  ;;  %v2092_v27 = vshrl.u32 %v8496_v36, 16 }
 0x220   : > { %5973 = vmatprep.mubr.msk.bf16.mxu0 %vm6836_vm0, %v6835_v1  ;;  %v3108_v35 = vsel %vm3049_vm6, %v3103_v56, %v3107_v8 }
 0x226   : > { %5590 = vmatmul.mubr.msk.bf16.gmra.mrb[8].mxu1 %vm826_vm3, %v7665_v12  ;;  %v3111_v12 = vor.u32 %v3110_v43, %v3109_v46  ;;  %v3130_v46 = vshrl.u32 %v7729_v62, 16  ;;  %v3133_v43 = vshll.u32 %v7729_v62, 16 }
 0x227   : > { %5974 = vmatmul.mubr.msk.bf16.gmra.mrb[48].mxu0 %vm826_vm3, %v3104_v59  ;;  %5593 = vmatprep.mubr.msk.bf16.mxu1 %vm6836_vm0, %v6835_v1  ;;  %v3125_v59 = vrot.slane %v2092_v27, 2 }
 0x228   : > { %5977 = vmatprep.mubr.msk.bf16.mxu0 %vm6836_vm0, %v6835_v1  ;;  %v3112_v19 = vsel %vm3049_vm6, %v3107_v8, %v3111_v12  ;;  %v4035_v8 = vld [vmem:[%s7988_s18 + $0x38] sm:$0xff] }
 0x22e   : > { %5594 = vmatmul.mubr.msk.bf16.gmra.mrb[12].mxu1 %vm826_vm3, %v7677_v23  ;;  %v3115_v23 = vor.u32 %v3114_v6, %v3113_v58  ;;  %v3132_v58 = vrot.slane %v3130_v46, 2  ;;  %v3135_v6 = vrot.slane %v3133_v43, 3  ;;  %v4050_v46 = vld [vmem:[%s7988_s18 + $0xb0] sm:$0xff]  ;;  %v6794_v43 = vld [vmem:[%s6915_s10 + $0x20] sm:$0xff]  }
 0x22f   : > { %5978 = vmatmul.mubr.msk.bf16.gmra.mrb[52].mxu0 %vm826_vm3, %v3108_v35  ;;  %5597 = vmatprep.mubr.msk.bf16.mxu1 %vm6836_vm0, %v6835_v1  ;;  %v3127_v35 = vor.u32 %v3126_v30, %v3125_v59  ;;  %v6793_v59 = vld [vmem:[%s6915_s10 + $0x18] sm:$0xff]  }
 0x230   : > { %5981 = vmatprep.mubr.msk.bf16.mxu0 %vm6836_vm0, %v6835_v1  ;;  %v3116_v33 = vsel %vm3049_vm6, %v3111_v12, %v3115_v23  ;;  %v4036_v12 = vld [vmem:[%s7988_s18 + $0x40] sm:$0xff]  ;;  %v3464_v30 = vrot.slane %v6793_v59, 3 }
 0x236   : > { %5598 = vmatmul.mubr.msk.bf16.gmra.mrb[16].mxu1 %vm826_vm3, %v7689_v39  ;;  %v3119_v39 = vor.u32 %v3118_v40, %v3117_v5  ;;  %v3136_v5 = vor.u32 %v3135_v6, %v3132_v58  ;;  %v3139_v40 = vshrl.u32 %v7745_v41, 16  ;;  %v4053_v58 = vld [vmem:[%s7988_s18 + $0xc8] sm:$0xff]  ;;  %v4054_v6 = vld [vmem:[%s7988_s18 + $0xd0] sm:$0xff] }
 0x237   : > { %5982 = vmatmul.mubr.msk.bf16.gmra.mrb[56].mxu0 %vm826_vm3, %v3112_v19  ;;  %5601 = vmatprep.mubr.msk.bf16.mxu1 %vm6836_vm0, %v6835_v1  ;;  %v3128_v19 = vsel %vm3049_vm6, %v3123_v37, %v3127_v35 }
 0x238   : > { %5985 = vmatprep.mubr.msk.bf16.mxu0 %vm6836_vm0, %v6835_v1  ;;  %v3120_v44 = vsel %vm3049_vm6, %v3115_v23, %v3119_v39  ;;  %v3124_v56 = vsel %vm3049_vm6, %v3119_v39, %v3123_v37  ;;  %v4038_v23 = vld [vmem:[%s7988_s18 + $0x50] sm:$0xff]  ;;  %v3142_v39 = vshll.u32 %v7745_v41, 16  ;;  %v3141_v45 = vrot.slane %v3139_v40, 2  ;;  %v4045_v37 = vld [vmem:[%s7988_s18 + $0x88] sm:$0xff]  ;;  %v4056_v40 = vld [vmem:[%s7988_s18 + $0xe0] sm:$0xff] }
 0x23e   : > { %5602 = vmatmul.mubr.msk.bf16.gmra.mrb[20].mxu1 %vm826_vm3, %v7701_v47  ;;  %v4028_v47 = vld [vmem:[%s7988_s18] sm:$0xff] }
 0x23f   : > { %5986 = vmatmul.mubr.msk.bf16.gmra.mrb[60].mxu0 %vm826_vm3, %v3116_v33  ;;  %5605 = vmatprep.mubr.msk.bf16.mxu1 %vm6836_vm0, %v6835_v1  ;;  %v4039_v33 = vld [vmem:[%s7988_s18 + $0x58] sm:$0xff] }
 0x240   : > { %5989 = vmatprep.mubr.msk.bf16.mxu0 %vm6836_vm0, %v6835_v1  ;;  %4072 = vperm.xlu0 %6754, %v4028_v47   ;;  %v3137_v47 = vsel %vm3049_vm6, %v3127_v35, %v3136_v5  ;;  %v4049_v35 = vld [vmem:[%s7988_s18 + $0xa8] sm:$0xff] }
 0x244   : > { %4077 = vperm.xlu0 %6754, %v4029_v13  }
 0x246   : > { %5606 = vmatmul.mubr.msk.bf16.gmra.mrb[24].mxu1 %vm826_vm3, %v7713_v60  ;;  %v4033_v60 = vld [vmem:[%s7988_s18 + $0x28] sm:$0xff] }
 0x247   : > { %5990 = vmatmul.mubr.msk.bf16.gmra.mrb[64].mxu0 %vm826_vm3, %v3120_v44  ;;  %5609 = vmatprep.mubr.msk.bf16.mxu1 %vm6836_vm0, %v6835_v1  ;;  %v3144_v44 = vrot.slane %v3142_v39, 3  ;;  %v4057_v39 = vld [vmem:[%s7988_s18 + $0xe8] sm:$0xff] }
 0x248   : > { %5993 = vmatprep.mubr.msk.bf16.mxu0 %vm6836_vm0, %v6835_v1  ;;  %4092 = vperm.xlu0 %6754, %v4032_v4   ;;  %v4046_v4 = vld [vmem:[%s7988_s18 + $0x90] sm:$0xff] }
 0x249   : > { %4097 = vperm.xlu1 %6755, %v4033_v60   ;;  %v3145_v13 = vor.u32 %v3144_v44, %v3141_v45  ;;  %v6792_v60 = vld [vmem:[%s6915_s10 + $0x10] sm:$0xff]   ;;  %v4059_v45 = vld [vmem:[%s7988_s18 + $0xf8] sm:$0xff]  ;;  %v4060_v44 = vld [vmem:[%s7988_s18 + $0x100] sm:$0xff] }
 0x24c   : > { %4102 = vperm.xlu0 %6754, %v4034_v24   ;;  %v4047_v24 = vld [vmem:[%s7988_s18 + $0x98] sm:$0xff] }
 0x24d   : > { %4107 = vperm.xlu1 %6755, %v4035_v8  }
 0x24e   : > { %5610 = vmatmul.mubr.msk.bf16.gmra.mrb[28].mxu1 %vm826_vm3, %v7726_v32  ;;  %v4037_v32 = vld [vmem:[%s7988_s18 + $0x48] sm:$0xff] }
 0x24f   : > { %5994 = vmatmul.mubr.msk.bf16.gmra.mrb[68].mxu0 %vm826_vm3, %v3124_v56  ;;  %5613 = vmatprep.mubr.msk.bf16.mxu1 %vm6836_vm0, %v6835_v1  ;;  %v3463_v56 = vrot.slane %v6792_v60, 3  ;;  %v4066_v60 = vld [vmem:[%s7988_s18 + $0x130] sm:$0xff] }
 0x250   : > { %5997 = vmatprep.mubr.msk.bf16.mxu0 %vm6836_vm0, %v6835_v1  ;;  %4112 = vperm.xlu0 %6754, %v4036_v12   ;;  %v3466_v12 = vrot.slane %v6794_v43, 3 }
 0x251   : > { %4117 = vperm.xlu1 %6755, %v4037_v32   ;;  %v3465_v8 = vsel %vm3462_vm7, %v3463_v56, %v3464_v30  ;;  %v4051_v32 = vld [vmem:[%s7988_s18 + $0xb8] sm:$0xff]  ;;  %v6798_v56 = vld [vmem:[%s6915_s10 + $0x40] sm:$0xff]  }
 0x252   : > { %v3474_v59 = vrot.slane %v6798_v56, 3  ;;  %v6806_v56 = vld [vmem:[%s6915_s10 + $0x80] sm:$0xff]  }
 0x254   : > { %4122 = vperm.xlu0 %6754, %v4038_v23   ;;  %v6795_v23 = vld [vmem:[%s6915_s10 + $0x28] sm:$0xff]  }
 0x255   : > { %4127 = vperm.xlu1 %6755, %v4039_v33   ;;  %v3468_v33 = vrot.slane %v6795_v23, 3 }
 0x256   : > { %5614 = vmatmul.mubr.msk.bf16.gmra.mrb[32].mxu1 %vm826_vm3, %v7742_v9  ;;  %v4041_v9 = vld [vmem:[%s7988_s18 + $0x68] sm:$0xff] }
 0x257   : > { %5998 = vmatmul.mubr.msk.bf16.gmra.mrb[72].mxu0 %vm826_vm3, %v3128_v19  ;;  %5617 = vmatprep.mubr.msk.bf16.mxu1 %vm6836_vm0, %v6835_v1  ;;  %v4052_v19 = vld [vmem:[%s7988_s18 + $0xc0] sm:$0xff] }
 0x258   : > { %6001 = vmatprep.mubr.msk.bf16.mxu0 %vm6836_vm0, %v6835_v1  ;;  %4132 = vperm.xlu0 %6754, %v4040_v28   ;;  %v4058_v28 = vld [vmem:[%s7988_s18 + $0xf0] sm:$0xff] }
 0x259   : > { %4137 = vperm.xlu1 %6755, %v4041_v9   ;;  %v6796_v9 = vld [vmem:[%s6915_s10 + $0x30] sm:$0xff]  }
 0x25c   : > { %4142 = vperm.xlu0 %6754, %v4042_v55   ;;  %v4061_v55 = vld [vmem:[%s7988_s18 + $0x108] sm:$0xff] }
 0x25d   : > { %4147 = vperm.xlu1 %6755, %v4043_v15   ;;  %v4062_v15 = vld [vmem:[%s7988_s18 + $0x110] sm:$0xff] }
 0x25e   : > { %5618 = vmatmul.mubr.msk.bf16.gmra.mrb[36].mxu1 %vm826_vm3, %v7759_v63  ;;  %v3146_v63 = vsel %vm3049_vm6, %v3136_v5, %v3145_v13  ;;  %v4055_v5 = vld [vmem:[%s7988_s18 + $0xd8] sm:$0xff] }
 0x25f   : > { %6002 = vmatmul.mubr.msk.bf16.gmra.mrb[76].mxu0 %vm826_vm3, %v3137_v47  ;;  %5621 = vmatprep.mubr.msk.bf16.mxu1 %vm6836_vm0, %v6835_v1  ;;  %v3470_v47 = vrot.slane %v6796_v9, 3  ;;  %v6797_v13 = vld [vmem:[%s6915_s10 + $0x38] sm:$0xff]   ;;  %v8497_v9 = vld [vmem:[#allocation7_spill] sm:$0xff] }
 0x260   : > { %6005 = vmatprep.mubr.msk.bf16.mxu0 %vm6836_vm0, %v6835_v1  ;;  %4152 = vperm.xlu0 %6754, %v4044_v0   ;;  %v3472_v0 = vrot.slane %v6797_v13, 3 }
 0x261   : > { %4157 = vperm.xlu1 %6755, %v4045_v37   ;;  %v4063_v37 = vld [vmem:[%s7988_s18 + $0x118] sm:$0xff] }
 0x264   : > { %4162 = vperm.xlu0 %6754, %v4046_v4   ;;  %v4065_v4 = vld [vmem:[%s7988_s18 + $0x128] sm:$0xff] }
 0x265   : > { %4167 = vperm.xlu1 %6755, %v4047_v24   ;;  %v4068_v24 = vld [vmem:[%s7988_s18 + $0x140] sm:$0xff] }
 0x266   : > { %5622 = vmatmul.mubr.msk.bf16.gmra.mrb[40].mxu1 %vm826_vm3, %v7775_v10  ;;  %v4048_v10 = vld [vmem:[%s7988_s18 + $0xa0] sm:$0xff] }
 0x267   : > { %6006 = vmatmul.mubr.msk.bf16.gmra.mrb[80].mxu0 %vm826_vm3, %v3146_v63  ;;  %5625 = vmatprep.mubr.msk.bf16.mxu1 %vm6836_vm0, %v6835_v1  ;;  %v4064_v63 = vld [vmem:[%s7988_s18 + $0x120] sm:$0xff] }
 0x268   : > { %6011 = vmatprep.mubr.msk.bf16.mxu0 %vm6836_vm0, %v6835_v1  ;;  %4172 = vperm.xlu0 %6754, %v4048_v10   ;;  %v3475_v10 = vsel %vm3462_vm7, %v3472_v0, %v3474_v59 }
 0x269   : > { %4177 = vperm.xlu1 %6755, %v4049_v35  }
 0x26c   : > { %4182 = vperm.xlu0 %6754, %v4050_v46  }
 0x26d   : > { %4187 = vperm.xlu1 %6755, %v4051_v32   ;;  %v6801_v32 = vld [vmem:[%s6915_s10 + $0x58] sm:$0xff]  }
 0x26e   : > { %5626 = vmatmul.mubr.msk.bf16.gmra.mrb[44].mxu1 %vm826_vm3, %v7792_v3  ;;  %v3467_v3 = vsel %vm3462_vm7, %v3464_v30, %v3466_v12  ;;  %v4067_v30 = vld [vmem:[%s7988_s18 + $0x138] sm:$0xff] }
 0x26f   : > { %6012 = vmatmul.mubr.msk.bf16.vlgmr.msra.gmra.mrb[0].mxu0 %vm826_vm3, %v3465_v8  ;;  %5629 = vmatprep.mubr.msk.bf16.mxu1 %vm6836_vm0, %v6835_v1  ;;  %v6799_v8 = vld [vmem:[%s6915_s10 + $0x48] sm:$0xff]  }
 0x270   : > { %6015 = vmatprep.mubr.msk.bf16.mxu0 %vm6836_vm0, %v6835_v1  ;;  %4192 = vperm.xlu0 %6754, %v4052_v19   ;;  %v3476_v35 = vrot.slane %v6799_v8, 3  ;;  %v3480_v19 = vrot.slane %v6801_v32, 3 }
 0x271   : > { %4197 = vperm.xlu1 %6755, %v4053_v58  }
 0x272   : > { %v3477_v46 = vsel %vm3462_vm7, %v3474_v59, %v3476_v35  ;;  %v3490_v59 = vrot.slane %v6806_v56, 3 }
 0x274   : > { %4202 = vperm.xlu0 %6754, %v4054_v6   ;;  %v6802_v6 = vld [vmem:[%s6915_s10 + $0x60] sm:$0xff]  }
 0x275   : > { %4207 = vperm.xlu1 %6755, %v4055_v5   ;;  %v3482_v23 = vrot.slane %v6802_v6, 3  ;;  %v2060_v5 = vrot.slane %v8481_v25, 2  ;;  %v2063_v25 = vrot.slane %v8482_v20, 1 }
 0x276   : > { %5630 = vmatmul.mubr.msk.bf16.gmra.mrb[48].mxu1 %vm826_vm3, %v7806_v50  ;;  %v3469_v50 = vsel %vm3462_vm7, %v3466_v12, %v3468_v33 }
 0x277   : > { %6016 = vmatmul.mubr.msk.bf16.gmra.mrb[4].mxu0 %vm826_vm3, %v3467_v3  ;;  %5633 = vmatprep.mubr.msk.bf16.mxu1 %vm6836_vm0, %v6835_v1 }
 0x278   : > { %6019 = vmatprep.mubr.msk.bf16.mxu0 %vm6836_vm0, %v6835_v1  ;;  %4212 = vperm.xlu0 %6754, %v4056_v40   ;;  %v3483_v40 = vsel %vm3462_vm7, %v3480_v19, %v3482_v23 }
 0x279   : > { %4217 = vperm.xlu1 %6755, %v4057_v39   ;;  %v6803_v39 = vld [vmem:[%s6915_s10 + $0x68] sm:$0xff]  }
 0x27c   : > { %4222 = vperm.xlu0 %6754, %v4058_v28   ;;  %v3484_v28 = vrot.slane %v6803_v39, 3 }
 0x27d   : > { %4227 = vperm.xlu1 %6755, %v4059_v45  }
 0x27e   : > { %5634 = vmatmul.mubr.msk.bf16.gmra.mrb[52].mxu1 %vm826_vm3, %v7820_v48  ;;  %v3471_v48 = vsel %vm3462_vm7, %v3468_v33, %v3470_v47  ;;  %v3485_v45 = vsel %vm3462_vm7, %v3482_v23, %v3484_v28  ;;  %v2087_v23 = vrot.slane %v8494_v57, 1 }
 0x27f   : > { %6020 = vmatmul.mubr.msk.bf16.gmra.mrb[8].mxu0 %vm826_vm3, %v3469_v50  ;;  %5637 = vmatprep.mubr.msk.bf16.mxu1 %vm6836_vm0, %v6835_v1 }
 0x280   : > { %6023 = vmatprep.mubr.msk.bf16.mxu0 %vm6836_vm0, %v6835_v1  ;;  %4232 = vperm.xlu0 %6754, %v4060_v44  }
 0x281   : > { %4237 = vperm.xlu1 %6755, %v4061_v55  }
 0x284   : > { %4242 = vperm.xlu0 %6754, %v4062_v15   ;;  %v2068_v15 = vrot.slane %v8485_v49, 2  ;;  %v2071_v49 = vrot.slane %v8486_v31, 1 }
 0x285   : > { %4247 = vperm.xlu1 %6755, %v4063_v37   ;;  %v6805_v37 = vld [vmem:[%s6915_s10 + $0x78] sm:$0xff]  }
 0x286   : > { %5638 = vmatmul.mubr.msk.bf16.gmra.mrb[56].mxu1 %vm826_vm3, %v7834_v26  ;;  %v3473_v26 = vsel %vm3462_vm7, %v3470_v47, %v3472_v0  ;;  %v2064_v47 = vrot.slane %v8483_v2, 2  ;;  %v2067_v2 = vrot.slane %v8484_v18, 1 }
 0x287   : > { %6024 = vmatmul.mubr.msk.bf16.gmra.mrb[12].mxu0 %vm826_vm3, %v3471_v48  ;;  %5641 = vmatprep.mubr.msk.bf16.mxu1 %vm6836_vm0, %v6835_v1  ;;  %v6804_v48 = vld [vmem:[%s6915_s10 + $0x70] sm:$0xff]  }
 0x288   : > { %6027 = vmatprep.mubr.msk.bf16.mxu0 %vm6836_vm0, %v6835_v1  ;;  %4252 = vperm.xlu0 %6754, %v4064_v63   ;;  %v2065_v44 = vor.u32 %v2064_v47, %v2063_v25  ;;  %v3486_v55 = vrot.slane %v6804_v48, 3  ;;  %v2069_v0 = vor.u32 %v2068_v15, %v2067_v2  ;;  %v3488_v63 = vrot.slane %v6805_v37, 3 }
 0x289   : > { %4257 = vperm.xlu1 %6755, %v4065_v4   ;;  %v2097_v25 = vrot.slane %v2095_v17, 2  ;;  %v2101_v48 = vshrl.u32 %v7521_v42, 16 }
 0x28a   : > { %v3487_v13 = vsel %vm3462_vm7, %v3484_v28, %v3486_v55  ;;  %v2070_v18 = vsel %vm2011_vm2, %v2065_v44, %v2069_v0  ;;  %v3489_v4 = vsel %vm3462_vm7, %v3486_v55, %v3488_v63  ;;  %v2104_v55 = vshll.u32 %v7521_v42, 16 }
 0x28c   : > { %4262 = vperm.xlu0 %6754, %v4066_v60  }
 0x28d   : > { %4267 = vperm.xlu1 %6755, %v4067_v30   ;;  %v2076_v30 = vrot.slane %v8489_v11, 2  ;;  %v2079_v11 = vrot.slane %v8490_v22, 1 }
 0x28e   : > { %5642 = vmatmul.mubr.msk.bf16.gmra.mrb[60].mxu1 %vm826_vm3, %v7848_v38  ;;  %v4069_v38 = vld [vmem:[%s7988_s18 + $0x148] sm:$0xff] }
 0x28f   : > { %6028 = vmatmul.mubr.msk.bf16.gmra.mrb[16].mxu0 %vm826_vm3, %v3473_v26  ;;  %5645 = vmatprep.mubr.msk.bf16.mxu1 %vm6836_vm0, %v6835_v1  ;;  %v2072_v26 = vrot.slane %v8487_v16, 2  ;;  %v2075_v16 = vrot.slane %v8488_v61, 1 }
 0x290   : > { %6031 = vmatprep.mubr.msk.bf16.mxu0 %vm6836_vm0, %v6835_v1  ;;  %4272 = vperm.xlu0 %6754, %v4068_v24   ;;  %v3491_v24 = vsel %vm3462_vm7, %v3488_v63, %v3490_v59 }
 0x291   : > { %4277 = vperm.xlu1 %6755, %v4069_v38   ;;  %v2073_v60 = vor.u32 %v2072_v26, %v2071_v49  ;;  %v6807_v38 = vld [vmem:[%s6915_s10 + $0x88] sm:$0xff]  }
 0x292   : > { %v3492_v8 = vrot.slane %v6807_v38, 3 }
 0x293   : > { %v2074_v31 = vsel %vm2011_vm2, %v2069_v0, %v2073_v60  ;;  %v2106_v0 = vrot.slane %v2104_v55, 2 }
 0x296   : > { %5646 = vmatmul.mubr.msk.bf16.gmra.mrb[64].mxu1 %vm826_vm3, %v7862_v53  ;;  %v6800_v53 = vld [vmem:[%s6915_s10 + $0x50] sm:$0xff]  }
 0x297   : > { %6032 = vmatmul.mubr.msk.bf16.gmra.mrb[20].mxu0 %vm826_vm3, %v3475_v10  ;;  %5649 = vmatprep.mubr.msk.bf16.mxu1 %vm6836_vm0, %v6835_v1  ;;  %v3478_v43 = vrot.slane %v6800_v53, 3  ;;  %v2077_v10 = vor.u32 %v2076_v30, %v2075_v16 }
 0x298   : > { %6035 = vmatprep.mubr.msk.bf16.mxu0 %vm6836_vm0, %v6835_v1 }
 0x299   : > { %v3479_v12 = vsel %vm3462_vm7, %v3476_v35, %v3478_v43  ;;  %v3481_v58 = vsel %vm3462_vm7, %v3478_v43, %v3480_v19  ;;  %v2078_v61 = vsel %vm2011_vm2, %v2073_v60, %v2077_v10  ;;  %v2080_v35 = vrot.slane %v8491_v7, 2  ;;  %v6808_v43 = vld [vmem:[%s6915_s10 + $0x90] sm:$0xff]  }
 0x29a   : > { %v2083_v7 = vrot.slane %v8492_v34, 1 }
 0x29b   : > { %v2081_v53 = vor.u32 %v2080_v35, %v2079_v11 }
 0x29d   : > { %v2082_v22 = vsel %vm2011_vm2, %v2077_v10, %v2081_v53 }
 0x29e   : > { %5650 = vmatmul.mubr.msk.bf16.gmra.mrb[68].mxu1 %vm826_vm3, %v7876_v52  ;;  %v1749_v52 = vrot.slane %v8496_v36, 1 }
 0x29f   : > { %6036 = vmatmul.mubr.msk.bf16.gmra.mrb[24].mxu0 %vm826_vm3, %v3477_v46  ;;  %5653 = vmatprep.mubr.msk.bf16.mxu1 %vm6836_vm0, %v6835_v1  ;;  %v3493_v46 = vsel %vm3462_vm7, %v3490_v59, %v3492_v8  ;;  %v3504_v59 = vrot.slane %v7745_v41, 3 }
 0x2a0   : > { %6039 = vmatprep.mubr.msk.bf16.mxu0 %vm6836_vm0, %v6835_v1  ;;  %v1750_v3 = vsel %vm1386_vm5, %v7887_v14, %v1749_v52  ;;  %v2059_v14 = vrot.slane %v8480_v21, 1 }
 0x2a2   : > { %v2061_v50 = vor.u32 %v2060_v5, %v2059_v14 }
 0x2a4   : > { %v2062_v21 = vsel %vm2011_vm2, %v8497_v9, %v2061_v50  ;;  %v2066_v20 = vsel %vm2011_vm2, %v2061_v50, %v2065_v44  ;;  %v6810_v50 = vld [vmem:[%s6915_s10 + $0xa0] sm:$0xff]  }
 0x2a5   : > { %v3498_v39 = vrot.slane %v6810_v50, 3 }
 0x2a6   : > { %5654 = vmatmul.mubr.msk.bf16.gmra.mrb[72].mxu1 %vm826_vm3, %v7893_v29  ;;  %v1751_v29 = vrot.slane %v7521_v42, 1 }
 0x2a7   : > { %6040 = vmatmul.mubr.msk.bf16.gmra.mrb[28].mxu0 %vm826_vm3, %v3479_v12  ;;  %5657 = vmatprep.mubr.msk.bf16.mxu1 %vm6836_vm0, %v6835_v1  ;;  %v3494_v12 = vrot.slane %v6808_v43, 3 }
 0x2a8   : > { %6043 = vmatprep.mubr.msk.bf16.mxu0 %vm6836_vm0, %v6835_v1  ;;  %v1752_v33 = vsel %vm1386_vm5, %v1749_v52, %v1751_v29  ;;  %v2084_v52 = vrot.slane %v8493_v51, 2 }
 0x2a9   : > { %v3495_v32 = vsel %vm3462_vm7, %v3492_v8, %v3494_v12 }
 0x2aa   : > { %v2085_v19 = vor.u32 %v2084_v52, %v2083_v7 }
 0x2ac   : > { %v2086_v6 = vsel %vm2011_vm2, %v2081_v53, %v2085_v19 }
 0x2ae   : > { %5658 = vmatmul.mubr.msk.bf16.gmra.mrb[76].mxu1 %vm826_vm3, %v1750_v3  ;;  %v6809_v3 = vld [vmem:[%s6915_s10 + $0x98] sm:$0xff]   ;;  %s4665_s10 = sshll.u32 %s8505_s29, 2  ;;  %s4666_s29 = sshll.u32 %s8507_s21, 3 }
 0x2af   : > { %6044 = vmatmul.mubr.msk.bf16.gmra.mrb[32].mxu0 %vm826_vm3, %v3481_v58  ;;  %5661 = vmatprep.mubr.msk.bf16.mxu1 %vm6836_vm0, %v6835_v1  ;;  %v3496_v58 = vrot.slane %v6809_v3, 3  ;;  %s8342_s25 = scalar_lea.vmem %s8406_s4, %s4665_s10  ;;  %s372_s28 = scalar_lea.vmem %s8407_s5, %s4666_s29 }
 0x2b0   : > { %6047 = vmatprep.mubr.msk.bf16.mxu0 %vm6836_vm0, %v6835_v1  ;;  %s379_s8 = scalar_lea.vmem %s8408_s6, %s4666_s29 }
 0x2b1   : > { %v3497_v5 = vsel %vm3462_vm7, %v3494_v12, %v3496_v58 }
 0x2b6   : > { %5662 = vmatmul.mubr.msk.bf16.gmra.mrb[80].mxu1 %vm826_vm3, %v1752_v33  ;;  %v2088_v33 = vrot.slane %v8495_v54, 2 }
 0x2b7   : > { %6048 = vmatmul.mubr.msk.bf16.gmra.mrb[36].mxu0 %vm826_vm3, %v3483_v40  ;;  %5711 = vmatprep.mubr.msk.bf16.mxu1 %vm6836_vm0, %v6835_v1 }
 0x2b8   : > { %6051 = vmatprep.mubr.msk.bf16.mxu0 %vm6836_vm0, %v6835_v1  ;;  %v2089_v40 = vor.u32 %v2088_v33, %v2087_v23 }
 0x2ba   : > { %v2090_v9 = vsel %vm2011_vm2, %v2085_v19, %v2089_v40 }
 0x2be   : > { %5712 = vmatmul.mubr.msk.bf16.vlgmr.msra.gmra.mrb[44].mxu1 %vm826_vm3, %v2062_v21  ;;  %v2094_v21 = vrot.slane %v2092_v27, 1  ;;  %v3500_v27 = vrot.slane %v8496_v36, 3  ;;  %v3502_v36 = vrot.slane %v7729_v62, 3 }
 0x2bf   : > { %6052 = vmatmul.mubr.msk.bf16.gmra.mrb[40].mxu0 %vm826_vm3, %v3485_v45  ;;  %5715 = vmatprep.mubr.msk.bf16.mxu1 %vm6836_vm0, %v6835_v1  ;;  %v3499_v45 = vsel %vm3462_vm7, %v3496_v58, %v3498_v39 }
 0x2c0   : > { %6055 = vmatprep.mubr.msk.bf16.mxu0 %vm6836_vm0, %v6835_v1  ;;  %v2098_v44 = vor.u32 %v2097_v25, %v2094_v21  ;;  %v3501_v63 = vsel %vm3462_vm7, %v3498_v39, %v3500_v27  ;;  %v3503_v56 = vsel %vm3462_vm7, %v3500_v27, %v3502_v36 }
 0x2c2   : > { %v2099_v15 = vsel %vm2011_vm2, %v2089_v40, %v2098_v44 }
 0x2c6   : > { %5716 = vmatmul.mubr.msk.bf16.gmra.mrb[48].mxu1 %vm826_vm3, %v2066_v20 }
 0x2c7   : > { %6056 = vmatmul.mubr.msk.bf16.gmra.mrb[44].mxu0 %vm826_vm3, %v3487_v13  ;;  %5719 = vmatprep.mubr.msk.bf16.mxu1 %vm6836_vm0, %v6835_v1  ;;  %v2103_v13 = vrot.slane %v2101_v48, 1  ;;  %v4083_v48 = vpop.permute.xlu1 %4082 }
 0x2c8   : > { %6059 = vmatprep.mubr.msk.bf16.mxu0 %vm6836_vm0, %v6835_v1 }
 0x2c9   : > { %v2107_v42 = vor.u32 %v2106_v0, %v2103_v13 }
 0x2ce   : > { %5720 = vmatmul.mubr.msk.bf16.gmra.mrb[52].mxu1 %vm826_vm3, %v2070_v18 }
 0x2cf   : > { %6060 = vmatmul.mubr.msk.bf16.gmra.mrb[48].mxu0 %vm826_vm3, %v3489_v4  ;;  %5723 = vmatprep.mubr.msk.bf16.mxu1 %vm6836_vm0, %v6835_v1  ;;  %v2108_v4 = vsel %vm2011_vm2, %v2098_v44, %v2107_v42 }
 0x2d0   : > { %6063 = vmatprep.mubr.msk.bf16.mxu0 %vm6836_vm0, %v6835_v1 }
 0x2d6   : > { %5724 = vmatmul.mubr.msk.bf16.gmra.mrb[56].mxu1 %vm826_vm3, %v2074_v31 }
 0x2d7   : > { %6064 = vmatmul.mubr.msk.bf16.gmra.mrb[52].mxu0 %vm826_vm3, %v3491_v24  ;;  %5727 = vmatprep.mubr.msk.bf16.mxu1 %vm6836_vm0, %v6835_v1  ;;  %v3505_v24 = vsel %vm3462_vm7, %v3502_v36, %v3504_v59  ;;  %v4088_v36 = vpop.permute.xlu1 %4087 }
 0x2d8   : > { %6067 = vmatprep.mubr.msk.bf16.mxu0 %vm6836_vm0, %v6835_v1 }
 0x2de   : > { %5728 = vmatmul.mubr.msk.bf16.gmra.mrb[60].mxu1 %vm826_vm3, %v2078_v61 }
 0x2df   : > { %6068 = vmatmul.mubr.msk.bf16.gmra.mrb[56].mxu0 %vm826_vm3, %v3493_v46  ;;  %5731 = vmatprep.mubr.msk.bf16.mxu1 %vm6836_vm0, %v6835_v1 }
 0x2e0   : > { %6071 = vmatprep.mubr.msk.bf16.mxu0 %vm6836_vm0, %v6835_v1 }
 0x2e6   : > { %5732 = vmatmul.mubr.msk.bf16.gmra.mrb[64].mxu1 %vm826_vm3, %v2082_v22 }
 0x2e7   : > { %6072 = vmatmul.mubr.msk.bf16.gmra.mrb[60].mxu0 %vm826_vm3, %v3495_v32  ;;  %5735 = vmatprep.mubr.msk.bf16.mxu1 %vm6836_vm0, %v6835_v1 }
 0x2e8   : > { %6075 = vmatprep.mubr.msk.bf16.mxu0 %vm6836_vm0, %v6835_v1 }
 0x2e9   : > { %v8248_v29 = vpop.f32.mrb[0].mxu1 }
 0x2ea   : > { %v5583_v34 = vpop.f32.mrb[1].mxu1 }
 0x2eb   : > { %v8250_v51 = vpop.f32.mrb[2].mxu1 }
 0x2ec   : > { %v5584_v14 = vpop.f32.mrb[3].mxu1 }
 0x2ee   : > { %5736 = vmatmul.mubr.msk.bf16.gmra.mrb[68].mxu1 %vm826_vm3, %v2086_v6 }
 0x2ef   : > { %6076 = vmatmul.mubr.msk.bf16.gmra.mrb[64].mxu0 %vm826_vm3, %v3497_v5  ;;  %5739 = vmatprep.mubr.msk.bf16.mxu1 %vm6836_vm0, %v6835_v1  ;;  %v4073_v5 = vpop.permute.xlu0 %4072 }
 0x2f0   : > { %6079 = vmatprep.mubr.msk.bf16.mxu0 %vm6836_vm0, %v6835_v1 }
 0x2f1   : > { %v8263_v28 = vpop.f32.mrb[4].mxu1 }
 0x2f2   : > { %v5587_v57 = vpop.f32.mrb[5].mxu1 }
 0x2f3   : > { %v8265_v54 = vpop.f32.mrb[6].mxu1 }
 0x2f4   : > { %v5588_v47 = vpop.f32.mrb[7].mxu1 }
 0x2f6   : > { %5740 = vmatmul.mubr.msk.bf16.gmra.mrb[72].mxu1 %vm826_vm3, %v2090_v9  ;;  %v4078_v9 = vpop.permute.xlu0 %4077 }
 0x2f7   : > { %6080 = vmatmul.mubr.msk.bf16.gmra.mrb[68].mxu0 %vm826_vm3, %v3499_v45  ;;  %5743 = vmatprep.mubr.msk.bf16.mxu1 %vm6836_vm0, %v6835_v1 }
 0x2f8   : > { %6083 = vmatprep.mubr.msk.bf16.mxu0 %vm6836_vm0, %v6835_v1 }
 0x2f9   : > { %v8282_v17 = vpop.f32.mrb[8].mxu1 }
 0x2fa   : > { %v5591_v20 = vpop.f32.mrb[9].mxu1 }
 0x2fb   : > { %v8284_v2 = vpop.f32.mrb[10].mxu1 }
 0x2fc   : > { %v5592_v37 = vpop.f32.mrb[11].mxu1 }
 0x2fe   : > { %5744 = vmatmul.mubr.msk.bf16.gmra.mrb[76].mxu1 %vm826_vm3, %v2099_v15 }
 0x2ff   : > { %6084 = vmatmul.mubr.msk.bf16.gmra.mrb[72].mxu0 %vm826_vm3, %v3501_v63  ;;  %5747 = vmatprep.mubr.msk.bf16.mxu1 %vm6836_vm0, %v6835_v1 }
 0x300   : > { %6087 = vmatprep.mubr.msk.bf16.mxu0 %vm6836_vm0, %v6835_v1 }
 0x301   : > { %v8295_v18 = vpop.f32.mrb[12].mxu1 }
 0x302   : > { %v5595_v49 = vpop.f32.mrb[13].mxu1 }
 0x303   : > { %v8297_v26 = vpop.f32.mrb[14].mxu1 }
 0x304   : > { %v5596_v60 = vpop.f32.mrb[15].mxu1 }
 0x306   : > { %5748 = vmatmul.mubr.msk.bf16.gmra.mrb[80].mxu1 %vm826_vm3, %v2108_v4 }
 0x307   : > { %6088 = vmatmul.mubr.msk.bf16.gmra.mrb[76].mxu0 %vm826_vm3, %v3503_v56 }
 0x308   : > { %6091 = vmatprep.mubr.msk.bf16.mxu0 %vm6836_vm0, %v6835_v1 }
 0x309   : > { %v8306_v62 = vpop.f32.mrb[16].mxu1 }
 0x30a   : > { %v5599_v31 = vpop.f32.mrb[17].mxu1 }
 0x30b   : > { %v8308_v16 = vpop.f32.mrb[18].mxu1 }
 0x30c   : > { %v5600_v30 = vpop.f32.mrb[19].mxu1 }
 0x30f   : > { %6092 = vmatmul.mubr.msk.bf16.gmra.mrb[80].mxu0 %vm826_vm3, %v3505_v24 }
 0x311   : > { %v8312_v10 = vpop.f32.mrb[20].mxu1 }
 0x312   : > { %v5603_v38 = vpop.f32.mrb[21].mxu1 }
 0x313   : > { %v8314_v8 = vpop.f32.mrb[22].mxu1 }
 0x314   : > { %v5604_v61 = vpop.f32.mrb[23].mxu1 }
 0x319   : > { %v8316_v11 = vpop.f32.mrb[24].mxu1 }
 0x31a   : > { %v5607_v1 = vpop.f32.mrb[25].mxu1 }
 0x31b   : > { %v8318_v41 = vpop.f32.mrb[26].mxu1  ;;  %v4093_v1 = vpop.permute.xlu0 %4092 }
 0x31c   : > { %v5608_v35 = vpop.f32.mrb[27].mxu1 }
 0x321   : > { %v8320_v46 = vpop.f32.mrb[28].mxu1 }
 0x322   : > { %v5611_v53 = vpop.f32.mrb[29].mxu1 }
 0x323   : > { %v8322_v43 = vpop.f32.mrb[30].mxu1 }
 0x324   : > { %v5612_v12 = vpop.f32.mrb[31].mxu1 }
 0x329   : > { %v8324_v22 = vpop.f32.mrb[32].mxu1 }
 0x32a   : > { %v5615_v7 = vpop.f32.mrb[33].mxu1 }
 0x32b   : > { %v8326_v52 = vpop.f32.mrb[34].mxu1  ;;  %v4098_v7 = vpop.permute.xlu1 %4097 }
 0x32c   : > { %v5616_v32 = vpop.f32.mrb[35].mxu1 }
 0x331   : > { %v8328_v19 = vpop.f32.mrb[36].mxu1 }
 0x332   : > { %v5619_v3 = vpop.f32.mrb[37].mxu1 }
 0x333   : > { %v8330_v58 = vpop.f32.mrb[38].mxu1 }
 0x334   : > { %v5620_v34 = vpop.f32.mrb[39].mxu1 }
 0x339   : > { %v8332_v6 = vpop.f32.mrb[40].mxu1 }
 0x33a   : > { %v5623_v23 = vpop.f32.mrb[41].mxu1 }
 0x33b   : > { %v8334_v33 = vpop.f32.mrb[42].mxu1 }
 0x33c   : > { %v5624_v14 = vpop.f32.mrb[43].mxu1 }
 0x342   : > { %v3609_v40 = vpop.f32.mrb[0].mxu0 }
 0x343   : > { %v6097_v50 = vadd.f32 %v3609_v40, %v8248_v29  ;;  %v6013_v39 = vpop.f32.mrb[1].mxu0 }
 0x344   : > { %v3612_v57 = vpop.f32.mrb[2].mxu0 }
 0x345   : > { %v4280_v21 = vmul.f32 %v6097_v50, %v4073_v5  ;;  %v6098_v25 = vadd.f32 %v3612_v57, %v8250_v51  ;;  %v6014_v47 = vpop.f32.mrb[3].mxu0 }
 0x347   : > { %v5001_v45 = vpack.c.bf16 %v6098_v25, %v6097_v50  ;;  %v4281_v44 = vmul.f32 %v6098_v25, %v4078_v9  ;;  %v4369_v55 = vmul.f32 %v4280_v21, %v4280_v21  ;;  %v4103_v9 = vpop.permute.xlu0 %4102 }
 0x349   : > { %5002 = vst [vmem:[%s8342_s25] sm:$0xff] %v5001_v45   ;;  %v4322_v29 = vadd.f32 %v4281_v44, %v4280_v21  ;;  %v4370_v27 = vmul.f32 %v4281_v44, %v4281_v44  ;;  %v4108_v45 = vpop.permute.xlu1 %4107 }
 0x34a   : > { %v3617_v20 = vpop.f32.mrb[4].mxu0 }
 0x34b   : > { %v4411_v15 = vadd.f32 %v4370_v27, %v4369_v55  ;;  %v6099_v13 = vadd.f32 %v3617_v20, %v8263_v28  ;;  %v6017_v51 = vpop.f32.mrb[5].mxu0 }
 0x34c   : > { %v3620_v0 = vpop.f32.mrb[6].mxu0 }
 0x34d   : > { %v4282_v37 = vmul.f32 %v6099_v13, %v4083_v48  ;;  %v6100_v63 = vadd.f32 %v3620_v0, %v8265_v54  ;;  %v6018_v42 = vpop.f32.mrb[7].mxu0 }
 0x34f   : > { %v4323_v49 = vadd.f32 %v4322_v29, %v4282_v37  ;;  %v4371_v4 = vmul.f32 %v4282_v37, %v4282_v37  ;;  %v5006_v60 = vpack.c.bf16 %v6100_v63, %v6099_v13  ;;  %v4283_v56 = vmul.f32 %v6100_v63, %v4088_v36  ;;  %v4113_v37 = vpop.permute.xlu0 %4112 }
 0x351   : > { %v4412_v59 = vadd.f32 %v4411_v15, %v4371_v4  ;;  %5103 = vst [vmem:[%s8342_s25 + $0x8] sm:$0xff] %v5006_v60   ;;  %v4324_v31 = vadd.f32 %v4323_v49, %v4283_v56  ;;  %v4372_v30 = vmul.f32 %v4283_v56, %v4283_v56  ;;  %v4118_v49 = vpop.permute.xlu1 %4117 }
 0x352   : > { %v3625_v24 = vpop.f32.mrb[8].mxu0 }
 0x353   : > { %v4413_v38 = vadd.f32 %v4412_v59, %v4372_v30  ;;  %v6101_v28 = vadd.f32 %v3625_v24, %v8282_v17  ;;  %v6021_v61 = vpop.f32.mrb[9].mxu0 }
 0x354   : > { %v3628_v35 = vpop.f32.mrb[10].mxu0 }
 0x355   : > { %v4284_v53 = vmul.f32 %v6101_v28, %v4093_v1  ;;  %v6102_v54 = vadd.f32 %v3628_v35, %v8284_v2  ;;  %v6022_v12 = vpop.f32.mrb[11].mxu0  ;;  %v4123_v1 = vpop.permute.xlu0 %4122 }
 0x356   : > { %v4128_v12 = vpop.permute.xlu1 %4127 }
 0x357   : > { %v4325_v32 = vadd.f32 %v4324_v31, %v4284_v53  ;;  %v4373_v3 = vmul.f32 %v4284_v53, %v4284_v53  ;;  %v5011_v34 = vpack.c.bf16 %v6102_v54, %v6101_v28  ;;  %v4285_v23 = vmul.f32 %v6102_v54, %v4098_v7 }
 0x359   : > { %v4414_v14 = vadd.f32 %v4413_v38, %v4373_v3  ;;  %5104 = vst [vmem:[%s8342_s25 + $0x10] sm:$0xff] %v5011_v34   ;;  %v4326_v5 = vadd.f32 %v4325_v32, %v4285_v23  ;;  %v4374_v40 = vmul.f32 %v4285_v23, %v4285_v23 }
 0x35a   : > { %v3633_v50 = vpop.f32.mrb[12].mxu0 }
 0x35b   : > { %v4415_v39 = vadd.f32 %v4414_v14, %v4374_v40  ;;  %v6103_v17 = vadd.f32 %v3633_v50, %v8295_v18  ;;  %v6025_v57 = vpop.f32.mrb[13].mxu0 }
 0x35c   : > { %v3636_v21 = vpop.f32.mrb[14].mxu0 }
 0x35d   : > { %v4286_v25 = vmul.f32 %v6103_v17, %v4103_v9  ;;  %v6104_v2 = vadd.f32 %v3636_v21, %v8297_v26  ;;  %v6026_v47 = vpop.f32.mrb[15].mxu0 }
 0x35f   : > { %v4327_v44 = vadd.f32 %v4326_v5, %v4286_v25  ;;  %v4375_v48 = vmul.f32 %v4286_v25, %v4286_v25  ;;  %v5016_v55 = vpack.c.bf16 %v6104_v2, %v6103_v17  ;;  %v4287_v29 = vmul.f32 %v6104_v2, %v4108_v45  ;;  %v4133_v17 = vpop.permute.xlu0 %4132  ;;  %v4138_v25 = vpop.permute.xlu1 %4137 }
 0x361   : > { %v4416_v27 = vadd.f32 %v4415_v39, %v4375_v48  ;;  %5105 = vst [vmem:[%s8342_s25 + $0x18] sm:$0xff] %v5016_v55   ;;  %v4328_v20 = vadd.f32 %v4327_v44, %v4287_v29  ;;  %v4376_v15 = vmul.f32 %v4287_v29, %v4287_v29 }
 0x362   : > { %v3641_v13 = vpop.f32.mrb[16].mxu0 }
 0x363   : > { %v4417_v51 = vadd.f32 %v4416_v27, %v4376_v15  ;;  %v6105_v18 = vadd.f32 %v3641_v13, %v8306_v62  ;;  %v6029_v0 = vpop.f32.mrb[17].mxu0  ;;  %v4143_v13 = vpop.permute.xlu0 %4142 }
 0x364   : > { %v3644_v63 = vpop.f32.mrb[18].mxu0 }
 0x365   : > { %v4288_v42 = vmul.f32 %v6105_v18, %v4113_v37  ;;  %v6106_v26 = vadd.f32 %v3644_v63, %v8308_v16  ;;  %v6030_v36 = vpop.f32.mrb[19].mxu0  ;;  %v4148_v37 = vpop.permute.xlu1 %4147 }
 0x367   : > { %v4329_v4 = vadd.f32 %v4328_v20, %v4288_v42  ;;  %v4377_v60 = vmul.f32 %v4288_v42, %v4288_v42  ;;  %v5021_v56 = vpack.c.bf16 %v6106_v26, %v6105_v18  ;;  %v4289_v59 = vmul.f32 %v6106_v26, %v4118_v49 }
 0x369   : > { %v4418_v31 = vadd.f32 %v4417_v51, %v4377_v60  ;;  %5106 = vst [vmem:[%s8342_s25 + $0x20] sm:$0xff] %v5021_v56   ;;  %v4330_v30 = vadd.f32 %v4329_v4, %v4289_v59  ;;  %v4378_v24 = vmul.f32 %v4289_v59, %v4289_v59 }
 0x36a   : > { %v3649_v38 = vpop.f32.mrb[20].mxu0 }
 0x36b   : > { %v4419_v28 = vadd.f32 %v4418_v31, %v4378_v24  ;;  %v6107_v62 = vadd.f32 %v3649_v38, %v8312_v10  ;;  %v6033_v61 = vpop.f32.mrb[21].mxu0 }
 0x36c   : > { %v3652_v35 = vpop.f32.mrb[22].mxu0 }
 0x36d   : > { %v4290_v53 = vmul.f32 %v6107_v62, %v4123_v1  ;;  %v6108_v16 = vadd.f32 %v3652_v35, %v8314_v8  ;;  %v6034_v54 = vpop.f32.mrb[23].mxu0 }
 0x36f   : > { %v4331_v7 = vadd.f32 %v4330_v30, %v4290_v53  ;;  %v4379_v32 = vmul.f32 %v4290_v53, %v4290_v53  ;;  %v5026_v3 = vpack.c.bf16 %v6108_v16, %v6107_v62  ;;  %v4291_v34 = vmul.f32 %v6108_v16, %v4128_v12  ;;  %v4153_v30 = vpop.permute.xlu0 %4152  ;;  %v4158_v62 = vpop.permute.xlu1 %4157 }
 0x371   : > { %v4420_v23 = vadd.f32 %v4419_v28, %v4379_v32  ;;  %5107 = vst [vmem:[%s8342_s25 + $0x28] sm:$0xff] %v5026_v3   ;;  %v4332_v14 = vadd.f32 %v4331_v7, %v4291_v34  ;;  %v4380_v5 = vmul.f32 %v4291_v34, %v4291_v34 }
 0x372   : > { %v3657_v40 = vpop.f32.mrb[24].mxu0 }
 0x373   : > { %v4421_v50 = vadd.f32 %v4420_v23, %v4380_v5  ;;  %v6109_v10 = vadd.f32 %v3657_v40, %v8316_v11  ;;  %v6037_v39 = vpop.f32.mrb[25].mxu0  ;;  %v4163_v32 = vpop.permute.xlu0 %4162 }
 0x374   : > { %v3660_v57 = vpop.f32.mrb[26].mxu0  ;;  %v4168_v40 = vpop.permute.xlu1 %4167 }
 0x375   : > { %v4292_v9 = vmul.f32 %v6109_v10, %v4133_v17  ;;  %v6110_v8 = vadd.f32 %v3660_v57, %v8318_v41  ;;  %v6038_v21 = vpop.f32.mrb[27].mxu0 }
 0x377   : > { %v4333_v2 = vadd.f32 %v4332_v14, %v4292_v9  ;;  %v4381_v47 = vmul.f32 %v4292_v9, %v4292_v9  ;;  %v5031_v45 = vpack.c.bf16 %v6110_v8, %v6109_v10  ;;  %v4293_v44 = vmul.f32 %v6110_v8, %v4138_v25  ;;  %v4173_v57 = vpop.permute.xlu0 %4172 }
 0x379   : > { %v4422_v48 = vadd.f32 %v4421_v50, %v4381_v47  ;;  %5108 = vst [vmem:[%s8342_s25 + $0x30] sm:$0xff] %v5031_v45   ;;  %v4334_v55 = vadd.f32 %v4333_v2, %v4293_v44  ;;  %v4382_v29 = vmul.f32 %v4293_v44, %v4293_v44 }
 0x37a   : > { %v3665_v27 = vpop.f32.mrb[28].mxu0 }
 0x37b   : > { %v4423_v20 = vadd.f32 %v4422_v48, %v4382_v29  ;;  %v6111_v11 = vadd.f32 %v3665_v27, %v8320_v46  ;;  %v6041_v15 = vpop.f32.mrb[29].mxu0 }
 0x37c   : > { %v3668_v51 = vpop.f32.mrb[30].mxu0 }
 0x37d   : > { %v4294_v18 = vmul.f32 %v6111_v11, %v4143_v13  ;;  %v6112_v41 = vadd.f32 %v3668_v51, %v8322_v43  ;;  %v6042_v0 = vpop.f32.mrb[31].mxu0 }
 0x37f   : > { %v4335_v63 = vadd.f32 %v4334_v55, %v4294_v18  ;;  %v4383_v42 = vmul.f32 %v4294_v18, %v4294_v18  ;;  %v5036_v26 = vpack.c.bf16 %v6112_v41, %v6111_v11  ;;  %v4295_v36 = vmul.f32 %v6112_v41, %v4148_v37  ;;  %v4178_v11 = vpop.permute.xlu1 %4177  ;;  %v4183_v41 = vpop.permute.xlu0 %4182 }
 0x381   : > { %v4424_v49 = vadd.f32 %v4423_v20, %v4383_v42  ;;  %5109 = vst [vmem:[%s8342_s25 + $0x38] sm:$0xff] %v5036_v26   ;;  %v4336_v4 = vadd.f32 %v4335_v63, %v4295_v36  ;;  %v4384_v60 = vmul.f32 %v4295_v36, %v4295_v36 }
 0x382   : > { %v3673_v56 = vpop.f32.mrb[32].mxu0 }
 0x383   : > { %v4425_v59 = vadd.f32 %v4424_v49, %v4384_v60  ;;  %v6113_v46 = vadd.f32 %v3673_v56, %v8324_v22  ;;  %v6045_v31 = vpop.f32.mrb[33].mxu0 }
 0x384   : > { %v3676_v24 = vpop.f32.mrb[34].mxu0 }
 0x385   : > { %v4296_v38 = vmul.f32 %v6113_v46, %v4153_v30  ;;  %v6114_v43 = vadd.f32 %v3676_v24, %v8326_v52  ;;  %v6046_v28 = vpop.f32.mrb[35].mxu0  ;;  %v4188_v30 = vpop.permute.xlu1 %4187 }
 0x387   : > { %v4337_v61 = vadd.f32 %v4336_v4, %v4296_v38  ;;  %v4385_v1 = vmul.f32 %v4296_v38, %v4296_v38  ;;  %v5041_v35 = vpack.c.bf16 %v6114_v43, %v6113_v46  ;;  %v4297_v53 = vmul.f32 %v6114_v43, %v4158_v62  ;;  %v4193_v62 = vpop.permute.xlu0 %4192 }
 0x389   : > { %v4426_v16 = vadd.f32 %v4425_v59, %v4385_v1  ;;  %5110 = vst [vmem:[%s8342_s25 + $0x40] sm:$0xff] %v5041_v35   ;;  %v4338_v54 = vadd.f32 %v4337_v61, %v4297_v53  ;;  %v4386_v12 = vmul.f32 %v4297_v53, %v4297_v53 }
 0x38a   : > { %v3681_v7 = vpop.f32.mrb[36].mxu0 }
 0x38b   : > { %v4427_v22 = vadd.f32 %v4426_v16, %v4386_v12  ;;  %v6115_v3 = vadd.f32 %v3681_v7, %v8328_v19  ;;  %v6049_v34 = vpop.f32.mrb[37].mxu0 }
 0x38c   : > { %v3684_v23 = vpop.f32.mrb[38].mxu0 }
 0x38d   : > { %v4298_v14 = vmul.f32 %v6115_v3, %v4163_v32  ;;  %v6116_v52 = vadd.f32 %v3684_v23, %v8330_v58  ;;  %v6050_v5 = vpop.f32.mrb[39].mxu0 }
 0x38e   : > { %v4198_v5 = vpop.permute.xlu1 %4197 }
 0x38f   : > { %v4339_v50 = vadd.f32 %v4338_v54, %v4298_v14  ;;  %v4387_v10 = vmul.f32 %v4298_v14, %v4298_v14  ;;  %v5046_v39 = vpack.c.bf16 %v6116_v52, %v6115_v3  ;;  %v4299_v17 = vmul.f32 %v6116_v52, %v4168_v40 }
 0x391   : > { %v4428_v9 = vadd.f32 %v4427_v22, %v4387_v10  ;;  %5111 = vst [vmem:[%s8342_s25 + $0x48] sm:$0xff] %v5046_v39   ;;  %v4340_v8 = vadd.f32 %v4339_v50, %v4299_v17  ;;  %v4388_v21 = vmul.f32 %v4299_v17, %v4299_v17  ;;  %v2300_v25 = vpop.f32.mrb[44].mxu1  ;;  %v4203_v17 = vpop.permute.xlu0 %4202 }
 0x392   : > { %v3689_v2 = vpop.f32.mrb[40].mxu0  ;;  %v5713_v47 = vpop.f32.mrb[45].mxu1 }
 0x393   : > { %v4429_v19 = vadd.f32 %v4428_v9, %v4388_v21  ;;  %v6117_v45 = vadd.f32 %v3689_v2, %v8332_v6  ;;  %v6053_v44 = vpop.f32.mrb[41].mxu0  ;;  %v2303_v58 = vpop.f32.mrb[46].mxu1 }
 0x394   : > { %v3692_v48 = vpop.f32.mrb[42].mxu0  ;;  %v5714_v55 = vpop.f32.mrb[47].mxu1 }
 0x395   : > { %v4300_v29 = vmul.f32 %v6117_v45, %v4173_v57  ;;  %v6118_v27 = vadd.f32 %v3692_v48, %v8334_v33  ;;  %v6054_v20 = vpop.f32.mrb[43].mxu0 }
 0x396   : > { %v4208_v20 = vpop.permute.xlu1 %4207 }
 0x397   : > { %v4341_v15 = vadd.f32 %v4340_v8, %v4300_v29  ;;  %v4389_v13 = vmul.f32 %v4300_v29, %v4300_v29  ;;  %v5051_v51 = vpack.c.bf16 %v6118_v27, %v6117_v45  ;;  %v4301_v18 = vmul.f32 %v6118_v27, %v4178_v11 }
 0x399   : > { %v4430_v0 = vadd.f32 %v4429_v19, %v4389_v13  ;;  %5112 = vst [vmem:[%s8342_s25 + $0x50] sm:$0xff] %v5051_v51   ;;  %v4342_v37 = vadd.f32 %v4341_v15, %v4301_v18  ;;  %v4390_v63 = vmul.f32 %v4301_v18, %v4301_v18  ;;  %v2308_v42 = vpop.f32.mrb[48].mxu1  ;;  %v4213_v18 = vpop.permute.xlu0 %4212 }
 0x39a   : > { %v3697_v6 = vpop.f32.mrb[44].mxu0  ;;  %v5717_v26 = vpop.f32.mrb[49].mxu1 }
 0x39b   : > { %v4431_v36 = vadd.f32 %v4430_v0, %v4390_v63  ;;  %v6119_v49 = vadd.f32 %v3697_v6, %v2300_v25  ;;  %v6057_v4 = vpop.f32.mrb[45].mxu0  ;;  %v2311_v60 = vpop.f32.mrb[50].mxu1 }
 0x39c   : > { %v3700_v33 = vpop.f32.mrb[46].mxu0  ;;  %v5718_v56 = vpop.f32.mrb[51].mxu1 }
 0x39d   : > { %v4302_v59 = vmul.f32 %v6119_v49, %v4183_v41  ;;  %v6120_v46 = vadd.f32 %v3700_v33, %v2303_v58  ;;  %v6058_v31 = vpop.f32.mrb[47].mxu0 }
 0x39e   : > { %v4218_v31 = vpop.permute.xlu1 %4217 }
 0x39f   : > { %v4343_v24 = vadd.f32 %v4342_v37, %v4302_v59  ;;  %v4391_v38 = vmul.f32 %v4302_v59, %v4302_v59  ;;  %v5056_v43 = vpack.c.bf16 %v6120_v46, %v6119_v49  ;;  %v4303_v28 = vmul.f32 %v6120_v46, %v4188_v30 }
 0x3a1   : > { %v4432_v61 = vadd.f32 %v4431_v36, %v4391_v38  ;;  %5113 = vst [vmem:[%s8342_s25 + $0x58] sm:$0xff] %v5056_v43   ;;  %v4344_v1 = vadd.f32 %v4343_v24, %v4303_v28  ;;  %v4392_v35 = vmul.f32 %v4303_v28, %v4303_v28  ;;  %v2316_v53 = vpop.f32.mrb[52].mxu1  ;;  %v4223_v28 = vpop.permute.xlu0 %4222 }
 0x3a2   : > { %v3705_v16 = vpop.f32.mrb[48].mxu0  ;;  %v5721_v54 = vpop.f32.mrb[53].mxu1 }
 0x3a3   : > { %v4433_v12 = vadd.f32 %v4432_v61, %v4392_v35  ;;  %v6121_v7 = vadd.f32 %v3705_v16, %v2308_v42  ;;  %v6061_v32 = vpop.f32.mrb[49].mxu0  ;;  %v2319_v22 = vpop.f32.mrb[54].mxu1 }
 0x3a4   : > { %v3708_v3 = vpop.f32.mrb[50].mxu0  ;;  %v5722_v34 = vpop.f32.mrb[55].mxu1 }
 0x3a5   : > { %v4304_v23 = vmul.f32 %v6121_v7, %v4193_v62  ;;  %v6122_v14 = vadd.f32 %v3708_v3, %v2311_v60  ;;  %v6062_v52 = vpop.f32.mrb[51].mxu0 }
 0x3a6   : > { %v4228_v52 = vpop.permute.xlu1 %4227 }
 0x3a7   : > { %v4345_v40 = vadd.f32 %v4344_v1, %v4304_v23  ;;  %v4393_v50 = vmul.f32 %v4304_v23, %v4304_v23  ;;  %v5061_v10 = vpack.c.bf16 %v6122_v14, %v6121_v7  ;;  %v4305_v39 = vmul.f32 %v6122_v14, %v4198_v5 }
 0x3a9   : > { %v4434_v57 = vadd.f32 %v4433_v12, %v4393_v50  ;;  %5114 = vst [vmem:[%s8342_s25 + $0x60] sm:$0xff] %v5061_v10   ;;  %v4346_v9 = vadd.f32 %v4345_v40, %v4305_v39  ;;  %v4394_v8 = vmul.f32 %v4305_v39, %v4305_v39  ;;  %v2324_v21 = vpop.f32.mrb[56].mxu1  ;;  %v4233_v39 = vpop.permute.xlu0 %4232 }
 0x3aa   : > { %v3713_v25 = vpop.f32.mrb[52].mxu0  ;;  %v5725_v2 = vpop.f32.mrb[57].mxu1 }
 0x3ab   : > { %v4435_v47 = vadd.f32 %v4434_v57, %v4394_v8  ;;  %v6123_v19 = vadd.f32 %v3713_v25, %v2316_v53  ;;  %v6065_v45 = vpop.f32.mrb[53].mxu0  ;;  %v2327_v44 = vpop.f32.mrb[58].mxu1 }
 0x3ac   : > { %v3716_v58 = vpop.f32.mrb[54].mxu0  ;;  %v5726_v48 = vpop.f32.mrb[59].mxu1 }
 0x3ad   : > { %v4306_v55 = vmul.f32 %v6123_v19, %v4203_v17  ;;  %v6124_v29 = vadd.f32 %v3716_v58, %v2319_v22  ;;  %v6066_v27 = vpop.f32.mrb[55].mxu0 }
 0x3ae   : > { %v4238_v27 = vpop.permute.xlu1 %4237 }
 0x3af   : > { %v4347_v11 = vadd.f32 %v4346_v9, %v4306_v55  ;;  %v4395_v15 = vmul.f32 %v4306_v55, %v4306_v55  ;;  %v5066_v13 = vpack.c.bf16 %v6124_v29, %v6123_v19  ;;  %v4307_v51 = vmul.f32 %v6124_v29, %v4208_v20 }
 0x3b1   : > { %v4436_v41 = vadd.f32 %v4435_v47, %v4395_v15  ;;  %5115 = vst [vmem:[%s8342_s25 + $0x68] sm:$0xff] %v5066_v13   ;;  %v4348_v0 = vadd.f32 %v4347_v11, %v4307_v51  ;;  %v4396_v37 = vmul.f32 %v4307_v51, %v4307_v51  ;;  %v2332_v63 = vpop.f32.mrb[60].mxu1  ;;  %v4243_v51 = vpop.permute.xlu0 %4242 }
 0x3b2   : > { %v3721_v42 = vpop.f32.mrb[56].mxu0  ;;  %v5729_v6 = vpop.f32.mrb[61].mxu1 }
 0x3b3   : > { %v4437_v26 = vadd.f32 %v4436_v41, %v4396_v37  ;;  %v6125_v36 = vadd.f32 %v3721_v42, %v2324_v21  ;;  %v6069_v49 = vpop.f32.mrb[57].mxu0  ;;  %v2335_v4 = vpop.f32.mrb[62].mxu1 }
 0x3b4   : > { %v3724_v60 = vpop.f32.mrb[58].mxu0  ;;  %v5730_v33 = vpop.f32.mrb[63].mxu1 }
 0x3b5   : > { %v4308_v56 = vmul.f32 %v6125_v36, %v4213_v18  ;;  %v6126_v59 = vadd.f32 %v3724_v60, %v2327_v44  ;;  %v6070_v46 = vpop.f32.mrb[59].mxu0 }
 0x3b6   : > { %v4248_v46 = vpop.permute.xlu1 %4247 }
 0x3b7   : > { %v4349_v30 = vadd.f32 %v4348_v0, %v4308_v56  ;;  %v4397_v24 = vmul.f32 %v4308_v56, %v4308_v56  ;;  %v5071_v38 = vpack.c.bf16 %v6126_v59, %v6125_v36  ;;  %v4309_v43 = vmul.f32 %v6126_v59, %v4218_v31 }
 0x3b9   : > { %v4438_v62 = vadd.f32 %v4437_v26, %v4397_v24  ;;  %5116 = vst [vmem:[%s8342_s25 + $0x70] sm:$0xff] %v5071_v38   ;;  %v4350_v61 = vadd.f32 %v4349_v30, %v4309_v43  ;;  %v4398_v1 = vmul.f32 %v4309_v43, %v4309_v43  ;;  %v2340_v35 = vpop.f32.mrb[64].mxu1  ;;  %v4253_v43 = vpop.permute.xlu0 %4252 }
 0x3ba   : > { %v3729_v53 = vpop.f32.mrb[60].mxu0  ;;  %v5733_v16 = vpop.f32.mrb[65].mxu1 }
 0x3bb   : > { %v4439_v54 = vadd.f32 %v4438_v62, %v4398_v1  ;;  %v6127_v12 = vadd.f32 %v3729_v53, %v2332_v63  ;;  %v6073_v7 = vpop.f32.mrb[61].mxu0  ;;  %v2343_v32 = vpop.f32.mrb[66].mxu1 }
 0x3bc   : > { %v3732_v22 = vpop.f32.mrb[62].mxu0  ;;  %v5734_v3 = vpop.f32.mrb[67].mxu1 }
 0x3bd   : > { %v4310_v34 = vmul.f32 %v6127_v12, %v4223_v28  ;;  %v6128_v23 = vadd.f32 %v3732_v22, %v2335_v4  ;;  %v6074_v14 = vpop.f32.mrb[63].mxu0 }
 0x3be   : > { %v4258_v14 = vpop.permute.xlu1 %4257 }
 0x3bf   : > { %v4351_v5 = vadd.f32 %v4350_v61, %v4310_v34  ;;  %v4399_v40 = vmul.f32 %v4310_v34, %v4310_v34  ;;  %v5076_v50 = vpack.c.bf16 %v6128_v23, %v6127_v12  ;;  %v4311_v10 = vmul.f32 %v6128_v23, %v4228_v52 }
 0x3c1   : > { %v4440_v17 = vadd.f32 %v4439_v54, %v4399_v40  ;;  %5117 = vst [vmem:[%s8342_s25 + $0x78] sm:$0xff] %v5076_v50   ;;  %v4352_v57 = vadd.f32 %v4351_v5, %v4311_v10  ;;  %v4400_v9 = vmul.f32 %v4311_v10, %v4311_v10  ;;  %v2348_v8 = vpop.f32.mrb[68].mxu1  ;;  %v4263_v10 = vpop.permute.xlu0 %4262 }
 0x3c2   : > { %v3737_v21 = vpop.f32.mrb[64].mxu0  ;;  %v5737_v25 = vpop.f32.mrb[69].mxu1 }
 0x3c3   : > { %v4441_v2 = vadd.f32 %v4440_v17, %v4400_v9  ;;  %v6129_v47 = vadd.f32 %v3737_v21, %v2340_v35  ;;  %v6077_v19 = vpop.f32.mrb[65].mxu0  ;;  %v2351_v45 = vpop.f32.mrb[70].mxu1 }
 0x3c4   : > { %v3740_v44 = vpop.f32.mrb[66].mxu0  ;;  %v5738_v58 = vpop.f32.mrb[71].mxu1 }
 0x3c5   : > { %v4312_v48 = vmul.f32 %v6129_v47, %v4233_v39  ;;  %v6130_v55 = vadd.f32 %v3740_v44, %v2343_v32  ;;  %v6078_v29 = vpop.f32.mrb[67].mxu0 }
 0x3c6   : > { %v4268_v29 = vpop.permute.xlu1 %4267 }
 0x3c7   : > { %v4353_v20 = vadd.f32 %v4352_v57, %v4312_v48  ;;  %v4401_v11 = vmul.f32 %v4312_v48, %v4312_v48  ;;  %v5081_v15 = vpack.c.bf16 %v6130_v55, %v6129_v47  ;;  %v4313_v13 = vmul.f32 %v6130_v55, %v4238_v27 }
 0x3c9   : > { %v4442_v18 = vadd.f32 %v4441_v2, %v4401_v11  ;;  %5118 = vst [vmem:[%s8342_s25 + $0x80] sm:$0xff] %v5081_v15   ;;  %v4354_v41 = vadd.f32 %v4353_v20, %v4313_v13  ;;  %v4402_v0 = vmul.f32 %v4313_v13, %v4313_v13  ;;  %v2356_v37 = vpop.f32.mrb[72].mxu1 }
 0x3ca   : > { %v3745_v63 = vpop.f32.mrb[68].mxu0  ;;  %v5741_v42 = vpop.f32.mrb[73].mxu1 }
 0x3cb   : > { %v4443_v6 = vadd.f32 %v4442_v18, %v4402_v0  ;;  %v6131_v26 = vadd.f32 %v3745_v63, %v2348_v8  ;;  %v6081_v36 = vpop.f32.mrb[69].mxu0  ;;  %v2359_v49 = vpop.f32.mrb[74].mxu1 }
 0x3cc   : > { %v3748_v4 = vpop.f32.mrb[70].mxu0  ;;  %v5742_v60 = vpop.f32.mrb[75].mxu1 }
 0x3cd   : > { %v4314_v33 = vmul.f32 %v6131_v26, %v4243_v51  ;;  %v6132_v56 = vadd.f32 %v3748_v4, %v2351_v45  ;;  %v6082_v59 = vpop.f32.mrb[71].mxu0  ;;  %v4273_v42 = vpop.permute.xlu0 %4272 }
 0x3ce   : > { %v4278_v4 = vpop.permute.xlu1 %4277 }
 0x3cf   : > { %v4355_v31 = vadd.f32 %v4354_v41, %v4314_v33  ;;  %v4403_v30 = vmul.f32 %v4314_v33, %v4314_v33  ;;  %v5086_v24 = vpack.c.bf16 %v6132_v56, %v6131_v26  ;;  %v4315_v38 = vmul.f32 %v6132_v56, %v4248_v46 }
 0x3d1   : > { %v4444_v28 = vadd.f32 %v4443_v6, %v4403_v30  ;;  %5119 = vst [vmem:[%s8342_s25 + $0x88] sm:$0xff] %v5086_v24   ;;  %v4356_v62 = vadd.f32 %v4355_v31, %v4315_v38  ;;  %v4404_v61 = vmul.f32 %v4315_v38, %v4315_v38  ;;  %v2364_v1 = vpop.f32.mrb[76].mxu1 }
 0x3d2   : > { %v3753_v35 = vpop.f32.mrb[72].mxu0  ;;  %v5745_v53 = vpop.f32.mrb[77].mxu1 }
 0x3d3   : > { %v4445_v16 = vadd.f32 %v4444_v28, %v4404_v61  ;;  %v6133_v54 = vadd.f32 %v3753_v35, %v2356_v37  ;;  %v6085_v12 = vpop.f32.mrb[73].mxu0  ;;  %v2367_v7 = vpop.f32.mrb[78].mxu1 }
 0x3d4   : > { %v3756_v32 = vpop.f32.mrb[74].mxu0  ;;  %v5746_v22 = vpop.f32.mrb[79].mxu1 }
 0x3d5   : > { %v4316_v3 = vmul.f32 %v6133_v54, %v4253_v43  ;;  %v6134_v34 = vadd.f32 %v3756_v32, %v2359_v49  ;;  %v6086_v23 = vpop.f32.mrb[75].mxu0 }
 0x3d7   : > { %v4357_v52 = vadd.f32 %v4356_v62, %v4316_v3  ;;  %v4405_v5 = vmul.f32 %v4316_v3, %v4316_v3  ;;  %v5091_v40 = vpack.c.bf16 %v6134_v34, %v6133_v54  ;;  %v4317_v50 = vmul.f32 %v6134_v34, %v4258_v14 }
 0x3d9   : > { %v4446_v39 = vadd.f32 %v4445_v16, %v4405_v5  ;;  %5120 = vst [vmem:[%s8342_s25 + $0x90] sm:$0xff] %v5091_v40   ;;  %v4358_v17 = vadd.f32 %v4357_v52, %v4317_v50  ;;  %v4406_v57 = vmul.f32 %v4317_v50, %v4317_v50  ;;  %v2372_v9 = vpop.f32.mrb[80].mxu1 }
 0x3da   : > { %v3761_v8 = vpop.f32.mrb[76].mxu0  ;;  %v5749_v21 = vpop.f32.mrb[81].mxu1 }
 0x3db   : > { %v4447_v25 = vadd.f32 %v4446_v39, %v4406_v57  ;;  %v6135_v2 = vadd.f32 %v3761_v8, %v2364_v1  ;;  %v6089_v47 = vpop.f32.mrb[77].mxu0  ;;  %v2375_v19 = vpop.f32.mrb[82].mxu1 }
 0x3dc   : > { %v3764_v45 = vpop.f32.mrb[78].mxu0  ;;  %v5750_v44 = vpop.f32.mrb[83].mxu1 }
 0x3dd   : > { %v4318_v58 = vmul.f32 %v6135_v2, %v4263_v10  ;;  %v6136_v48 = vadd.f32 %v3764_v45, %v2367_v7  ;;  %v6090_v55 = vpop.f32.mrb[79].mxu0 }
 0x3df   : > { %v4359_v27 = vadd.f32 %v4358_v17, %v4318_v58  ;;  %v4407_v20 = vmul.f32 %v4318_v58, %v4318_v58  ;;  %v5096_v11 = vpack.c.bf16 %v6136_v48, %v6135_v2  ;;  %v4319_v15 = vmul.f32 %v6136_v48, %v4268_v29 }
 0x3e1   : > { %v4448_v13 = vadd.f32 %v4447_v25, %v4407_v20  ;;  %5121 = vst [vmem:[%s8342_s25 + $0x98] sm:$0xff] %v5096_v11   ;;  %v4360_v51 = vadd.f32 %v4359_v27, %v4319_v15  ;;  %v4408_v18 = vmul.f32 %v4319_v15, %v4319_v15 }
 0x3e2   : > { %v3769_v41 = vpop.f32.mrb[80].mxu0 }
 0x3e3   : > { %v4449_v0 = vadd.f32 %v4448_v13, %v4408_v18  ;;  %v6137_v37 = vadd.f32 %v3769_v41, %v2372_v9  ;;  %v6093_v63 = vpop.f32.mrb[81].mxu0 }
 0x3e4   : > { %v3772_v6 = vpop.f32.mrb[82].mxu0 }
 0x3e5   : > { %v4320_v26 = vmul.f32 %v6137_v37, %v4273_v42  ;;  %v6138_v36 = vadd.f32 %v3772_v6, %v2375_v19  ;;  %v6094_v49 = vpop.f32.mrb[83].mxu0 }
 0x3e7   : > { %v4361_v60 = vadd.f32 %v4360_v51, %v4320_v26  ;;  %v4409_v33 = vmul.f32 %v4320_v26, %v4320_v26  ;;  %v5101_v56 = vpack.c.bf16 %v6138_v36, %v6137_v37  ;;  %v4321_v59 = vmul.f32 %v6138_v36, %v4278_v4 }
 0x3e9   : > { %v4450_v46 = vadd.f32 %v4449_v0, %v4409_v33  ;;  %5122 = vst [vmem:[%s8342_s25 + $0xa0] sm:$0xff] %v5101_v56   ;;  %v4362_v31 = vadd.f32 %v4361_v60, %v4321_v59  ;;  %v4410_v30 = vmul.f32 %v4321_v59, %v4321_v59 }
 0x3eb   : > { %v4363_v24 = vrot.slane %v4362_v31, 4  ;;  %v4451_v38 = vadd.f32 %v4450_v46, %v4410_v30 }
 0x3ed   : > { %v4364_v43 = vadd.f32 %v4363_v24, %v4362_v31  ;;  %v4452_v28 = vrot.slane %v4451_v38, 4 }
 0x3ef   : > { %v4365_v62 = vrot.slane %v4364_v43, 2  ;;  %v4453_v61 = vadd.f32 %v4452_v28, %v4451_v38 }
 0x3f1   : > { %v4366_v1 = vadd.f32 %v4365_v62, %v4364_v43  ;;  %v4454_v35 = vrot.slane %v4453_v61, 2 }
 0x3f3   : > { %v4367_v53 = vrot.slane %v4366_v1, 1  ;;  %v4455_v16 = vadd.f32 %v4454_v35, %v4453_v61 }
 0x3f5   : > { %v4368_v54 = vadd.f32 %v4367_v53, %v4366_v1  ;;  %v4456_v12 = vrot.slane %v4455_v16, 1 }
 0x3f7   : > { %v4457_v7 = vadd.f32 %v4456_v12, %v4455_v16  ;;  %4458 = vst [vmem:[%s372_s28] sm:$0xff] %v4368_v54 }
 0x3f9   : > { %4459 = vst [vmem:[%s379_s8] sm:$0xff] %v4457_v7 }
 0x3fa PF: > { %s17_s23 = sadd.s32 1, %s6833_s23   ;;  %s8498_s21 = smov %s6829_s22 }
 0x3fb   : > { %p14_p8 = scmp.ge.s32.totalorder %s17_s23, 4   ;;  %s8499_s22 = smov %s8501_s24 }
 0x3fd   :  { %16 = sbr.rel (!%p14_p8) target bundleno = 2 (0x2), region = 107 }

</bundles_post_ra>
